<compile_context>
chip_gen: v7x
topology: tpu7x:2x2x1
jax: 0.10.0
libtpu: 0.0.40
codegen_flags: <defaults>
</compile_context>

<pallas_src>
import math

import jax
import jax.numpy as jnp
from jax import lax
from jax.experimental import pallas as pl
from jax.experimental.pallas import tpu as pltpu

_INV_SQRT2 = 1.0 / math.sqrt(2.0)
PAD = 128  # lane-dense padding for every feature dimension


# ------------------------------ fused kernel ------------------------------- #

def _expert_head_kernel(x_ref, gate_w_ref, gate_b_ref,
                        lw_ref, bias_ref, skw_ref, fw_ref,
                        combined_ref, eout_ref):
    """One grid step = one batch tile; all experts unrolled in-kernel.

    x_ref:      (TB, PAD)             input tile (zero padded)
    gate_w_ref: (PAD, PAD)            gate weight [in, E_pad]      (resident)
    gate_b_ref: (1, PAD)                                            (resident)
    lw_ref:     (E, L, PAD, PAD)      layer weights, BN folded      (resident)
    bias_ref:   (E, L+2, 1, PAD)      [layer biases..., skip_b, final_b]
    skw_ref:    (E, PAD, PAD)         skip weights                  (resident)
    fw_ref:     (E, PAD, PAD)         final weights                 (resident)
    combined_ref: (TB, PAD)           gated sum output
    eout_ref:   (E, TB, PAD)          per-expert output slab
    """
    E = lw_ref.shape[0]
    L = lw_ref.shape[1]

    x = x_ref[...]  # (TB, PAD) f32

    # Gate: linear + masked softmax over the first E lanes (padded lanes -> 0).
    logits = jnp.dot(x, gate_w_ref[...],
                     preferred_element_type=jnp.float32) + gate_b_ref[...]
    lane = lax.broadcasted_iota(jnp.int32, logits.shape, 1)
    logits = jnp.where(lane < E, logits, -1e30)
    m = jnp.max(logits, axis=-1, keepdims=True)
    p = jnp.exp(logits - m)
    gate = p / jnp.sum(p, axis=-1, keepdims=True)  # (TB, PAD)

    combined = jnp.zeros_like(x)
    for e in range(E):  # static unroll — E is tiny, weights are VMEM-resident
        h = x
        for l in range(L):  # static unroll — L is small
            z = jnp.dot(h, lw_ref[e, l],
                        preferred_element_type=jnp.float32) + bias_ref[e, l]
            h = 0.5 * z * (1.0 + lax.erf(z * _INV_SQRT2))  # exact-erf GELU (nn.GELU)
        res = jnp.dot(x, skw_ref[e],
                      preferred_element_type=jnp.float32) + bias_ref[e, L]
        out = jnp.dot(h + res, fw_ref[e],
                      preferred_element_type=jnp.float32) + bias_ref[e, L + 1]
        eout_ref[e] = out
        # Static lane slice of the gate (no per-expert lane reduce needed).
        combined = combined + gate[:, e:e + 1] * out

    combined_ref[...] = combined


# ------------------------------ forward pass ------------------------------- #

def _expert_head_fwd(x, packed, out_dim):
    B, F = x.shape
    E, L = packed["layers_w"].shape[:2]

    # Batch tile: grow with B up to 256 (amortizes per-step overhead and MXU
    # drain latency); padded tail rows are independent and sliced off below.
    TB = min(256, ((B + 7) // 8) * 8)
    nb = -(-B // TB)
    B_pad = nb * TB

    x_pad = jnp.zeros((B_pad, PAD), jnp.float32).at[:B, :F].set(x)

    combined_pad, expert_pad = pl.pallas_call(
        _expert_head_kernel,
        out_shape=(
            jax.ShapeDtypeStruct((B_pad, PAD), jnp.float32),       # combined
            jax.ShapeDtypeStruct((E, B_pad, PAD), jnp.float32),    # per-expert slab
        ),
        grid=(nb,),
        in_specs=[
            pl.BlockSpec((TB, PAD), lambda bi: (bi, 0)),               # x tile
            pl.BlockSpec((PAD, PAD), lambda bi: (0, 0)),               # gate_w
            pl.BlockSpec((1, PAD), lambda bi: (0, 0)),                 # gate_b
            pl.BlockSpec((E, L, PAD, PAD), lambda bi: (0, 0, 0, 0)),   # layers_w
            pl.BlockSpec((E, L + 2, 1, PAD), lambda bi: (0, 0, 0, 0)), # biases
            pl.BlockSpec((E, PAD, PAD), lambda bi: (0, 0, 0)),         # skip_w
            pl.BlockSpec((E, PAD, PAD), lambda bi: (0, 0, 0)),         # final_w
        ],
        out_specs=(
            pl.BlockSpec((TB, PAD), lambda bi: (bi, 0)),               # combined
            pl.BlockSpec((E, TB, PAD), lambda bi: (0, bi, 0)),         # expert outputs
        ),
        compiler_params=pltpu.CompilerParams(
            dimension_semantics=("parallel",)),
    )(x_pad, packed["gate_w"], packed["gate_b"],
      packed["layers_w"], packed["biases"],
      packed["skip_w"], packed["final_w"])

    combined = combined_pad[:B, :out_dim]
    expert_outputs = [expert_pad[e, :B, :out_dim] for e in range(E)]
    return combined, expert_outputs


expert_head_forward = jax.jit(_expert_head_fwd, static_argnames=("out_dim",))


# --------------------------- parameter packing ------------------------------ #

def _pad2(a, rows, cols):
    return jnp.zeros((rows, cols), jnp.float32).at[:a.shape[0], :a.shape[1]].set(a)


def pack_params(params):
    """Transpose to [in,out], fold eval-mode BN into the linears, zero-pad to
    lane-dense 128x128 tiles, and stack per-expert.  Done once, outside jit."""
    experts = params["experts"]
    L = len(experts[0]["layers"])
    # TODO(synk): experts with differing layer counts would need per-depth handling.
    assert all(len(p["layers"]) == L for p in experts)
    assert all(w.shape[0] <= PAD and w.shape[1] <= PAD
               for p in experts for w in
               [p["skip_w"], p["final_w"]] + [lp["w"] for lp in p["layers"]]), \
        "dims > 128 would need K/N tiling"  # TODO(synk): tile K/N for large dims

    lw, biases, skw, fw = [], [], [], []
    for p in experts:
        lws, bs = [], []
        for lp in p["layers"]:
            # y = BN(x @ W^T + b) = x @ (W^T * scale) + (b*scale + shift)
            wt = lp["w"].T * lp["scale"][None, :]
            bb = lp["b"] * lp["scale"] + lp["shift"]
            lws.append(_pad2(wt, PAD, PAD))
            bs.append(_pad2(bb[None, :], 1, PAD))
        bs.append(_pad2(p["skip_b"][None, :], 1, PAD))
        bs.append(_pad2(p["final_b"][None, :], 1, PAD))
        lw.append(jnp.stack(lws))
        biases.append(jnp.stack(bs))
        skw.append(_pad2(p["skip_w"].T, PAD, PAD))
        fw.append(_pad2(p["final_w"].T, PAD, PAD))

    return {
        "layers_w": jnp.stack(lw),      # [E, L, PAD, PAD]
        "biases": jnp.stack(biases),    # [E, L+2, 1, PAD]  (layers..., skip, final)
        "skip_w": jnp.stack(skw),       # [E, PAD, PAD]
        "final_w": jnp.stack(fw),       # [E, PAD, PAD]
        "gate_w": _pad2(params["gate_w"].T, PAD, PAD),      # [in_pad, E_pad]
        "gate_b": _pad2(params["gate_b"][None, :], 1, PAD),
    }


# ----------------------------- param init / ref ----------------------------- #

def init_params(key, in_features, expert_configs):
    bn_eps = 1e-5

    def nxt():
        nonlocal key
        key, sub = jax.random.split(key)
        return sub

    def linear(in_d, out_d):
        lim = 1.0 / math.sqrt(in_d)
        w = jax.random.uniform(nxt(), (out_d, in_d), jnp.float32, -lim, lim)
        b = jax.random.uniform(nxt(), (out_d,), jnp.float32, -lim, lim)
        return w, b

    experts = []
    for hidden_dims in expert_configs:
        layers = []
        prev = in_features
        for h in hidden_dims:
            w, b = linear(prev, h)
            gamma = 1.0 + 0.1 * jax.random.normal(nxt(), (h,), jnp.float32)
            beta = 0.1 * jax.random.normal(nxt(), (h,), jnp.float32)
            r_mean = 0.1 * jax.random.normal(nxt(), (h,), jnp.float32)
            r_var = jnp.abs(jax.random.normal(nxt(), (h,), jnp.float32)) + 0.5
            scale = gamma / jnp.sqrt(r_var + bn_eps)
            shift = beta - r_mean * scale
            layers.append({"w": w, "b": b, "scale": scale, "shift": shift})
            prev = h
        skip_w, skip_b = linear(in_features, hidden_dims[-1])
        final_w, final_b = linear(hidden_dims[-1], hidden_dims[-1])
        experts.append({
            "layers": layers,
            "skip_w": skip_w, "skip_b": skip_b,
            "final_w": final_w, "final_b": final_b,
        })

    gate_w, gate_b = linear(in_features, len(expert_configs))
    return {"experts": experts, "gate_w": gate_w, "gate_b": gate_b}


def reference_forward(x, params):
    """Pure-JAX reference mirroring the PyTorch eval-mode forward."""
    logits = x @ params["gate_w"].T + params["gate_b"]
    gate = jax.nn.softmax(logits, axis=-1)
    outs = []
    for p in params["experts"]:
        res = x @ p["skip_w"].T + p["skip_b"]
        h = x
        for lp in p["layers"]:
            z = h @ lp["w"].T + lp["b"]
            z = z * lp["scale"] + lp["shift"]
            h = 0.5 * z * (1.0 + lax.erf(z * _INV_SQRT2))
        h = (h + res) @ p["final_w"].T + p["final_b"]
        outs.append(h)
    stacked = jnp.stack(outs, axis=-1)                  # [B, D, E]
    combined = jnp.sum(stacked * gate[:, None, :], axis=-1)
    return combined, outs


# ---------------------------------- main ------------------------------------ #

if __name__ == "__main__":
    key = jax.random.PRNGKey(0)
    batch = 8
    in_features = 32
    expert_configs = [[64, 32], [48, 32], [32, 32]]   # all experts end at D=32

    k_x, k_p = jax.random.split(key)
    x = jax.random.normal(k_x, (batch, in_features), jnp.float32)
    params = init_params(k_p, in_features, expert_configs)
    packed = pack_params(params)

    combined, expert_outs = expert_head_forward(
        x, packed, out_dim=expert_configs[0][-1])
    jax.block_until_ready(combined)
    for eo in expert_outs:
        jax.block_until_ready(eo)

    ref_combined, ref_outs = reference_forward(x, params)
    assert jnp.allclose(combined, ref_combined, atol=1e-4, rtol=1e-4)
    for a, b in zip(expert_outs, ref_outs):
        assert jnp.allclose(a, b, atol=1e-4, rtol=1e-4)

    print("KERNEL_OK")
</pallas_src>

<mosaic_0001>
module attributes {stable_mosaic.version = 11 : i64} {
  func.func @_expert_head_kernel(%arg0: i32, %arg1: memref<8x128xf32, #tpu.memory_space<vmem>>, %arg2: memref<128x128xf32, #tpu.memory_space<vmem>>, %arg3: memref<1x128xf32, #tpu.memory_space<vmem>>, %arg4: memref<3x2x128x128xf32, #tpu.memory_space<vmem>>, %arg5: memref<3x4x1x128xf32, #tpu.memory_space<vmem>>, %arg6: memref<3x128x128xf32, #tpu.memory_space<vmem>>, %arg7: memref<3x128x128xf32, #tpu.memory_space<vmem>>, %arg8: memref<8x128xf32, #tpu.memory_space<vmem>>, %arg9: memref<3x8x128xf32, #tpu.memory_space<vmem>>) attributes {dimension_semantics = [#tpu.dimension_semantics<parallel>], iteration_bounds = array<i64: 1>, scalar_prefetch = 0 : i64, scratch_operands = 0 : i64, tpu.core_type = #tpu.core_type<tc>, window_params = [{transform_indices = @transform_0, window_bounds = array<i64: 8, 128>}, {pipeline_mode = #tpu.pipeline_mode<synchronous>, transform_indices = @transform_1, window_bounds = array<i64: 128, 128>}, {pipeline_mode = #tpu.pipeline_mode<synchronous>, transform_indices = @transform_2, window_bounds = array<i64: 1, 128>}, {pipeline_mode = #tpu.pipeline_mode<synchronous>, transform_indices = @transform_3, window_bounds = array<i64: 3, 2, 128, 128>}, {pipeline_mode = #tpu.pipeline_mode<synchronous>, transform_indices = @transform_4, window_bounds = array<i64: 3, 4, 1, 128>}, {pipeline_mode = #tpu.pipeline_mode<synchronous>, transform_indices = @transform_5, window_bounds = array<i64: 3, 128, 128>}, {pipeline_mode = #tpu.pipeline_mode<synchronous>, transform_indices = @transform_6, window_bounds = array<i64: 3, 128, 128>}, {transform_indices = @transform_7, window_bounds = array<i64: 8, 128>}, {transform_indices = @transform_8, window_bounds = array<i64: 3, 8, 128>}]} {
    %c0 = arith.constant 0 : index
    %c0_0 = arith.constant 0 : index
    %0 = vector.load %arg1[%c0, %c0_0] : memref<8x128xf32, #tpu.memory_space<vmem>>, vector<8x128xf32>
    %c0_1 = arith.constant 0 : index
    %c0_2 = arith.constant 0 : index
    %1 = vector.load %arg2[%c0_1, %c0_2] : memref<128x128xf32, #tpu.memory_space<vmem>>, vector<128x128xf32>
    %cst = arith.constant dense<0.000000e+00> : vector<8x128xf32>
    %2 = tpu.matmul %0, %1, %cst {dimension_numbers = #tpu.dot_dimension_numbers<[1], [0], [0], [1], [0, 0, 1, 1], [], []>} : vector<8x128xf32>, vector<128x128xf32>, vector<8x128xf32> -> vector<8x128xf32>
    %c0_3 = arith.constant 0 : index
    %c0_4 = arith.constant 0 : index
    %3 = vector.load %arg3[%c0_3, %c0_4] : memref<1x128xf32, #tpu.memory_space<vmem>>, vector<1x128xf32>
    %4 = vector.broadcast %3 : vector<1x128xf32> to vector<8x128xf32>
    %5 = arith.addf %2, %4 : vector<8x128xf32>
    %6 = tpu.iota {dimensions = array<i32: 1>} : vector<8x128xi32>
    %c3_i32 = arith.constant 3 : i32
    %7 = vector.broadcast %c3_i32 : i32 to vector<8x128xi32>
    %8 = arith.cmpi slt, %6, %7 : vector<8x128xi32>
    %cst_5 = arith.constant -1.000000e+30 : f32
    %9 = vector.broadcast %cst_5 : f32 to vector<8x128xf32>
    %10 = arith.select %8, %5, %9 : vector<8x128xi1>, vector<8x128xf32>
    %cst_6 = arith.constant dense<0xFF800000> : vector<8xf32>
    %11 = vector.multi_reduction <maximumf>, %10, %cst_6 [1] : vector<8x128xf32> to vector<8xf32>
    %12 = vector.shape_cast %11 : vector<8xf32> to vector<8x1xf32>
    %13 = vector.broadcast %12 : vector<8x1xf32> to vector<8x128xf32>
    %14 = arith.subf %10, %13 : vector<8x128xf32>
    %15 = math.exp %14 : vector<8x128xf32>
    %cst_7 = arith.constant dense<0.000000e+00> : vector<8xf32>
    %16 = vector.multi_reduction <add>, %15, %cst_7 [1] : vector<8x128xf32> to vector<8xf32>
    %17 = vector.shape_cast %16 : vector<8xf32> to vector<8x1xf32>
    %18 = vector.broadcast %17 : vector<8x1xf32> to vector<8x128xf32>
    %19 = arith.divf %15, %18 : vector<8x128xf32>
    %cst_8 = arith.constant 0.000000e+00 : f32
    %20 = vector.broadcast %cst_8 : f32 to vector<8x128xf32>
    %c0_9 = arith.constant 0 : index
    %c0_10 = arith.constant 0 : index
    %c0_11 = arith.constant 0 : index
    %c0_12 = arith.constant 0 : index
    %21 = vector.load %arg4[%c0_9, %c0_10, %c0_11, %c0_12] : memref<3x2x128x128xf32, #tpu.memory_space<vmem>>, vector<1x1x128x128xf32>
    %22 = vector.shape_cast %21 : vector<1x1x128x128xf32> to vector<128x128xf32>
    %cst_13 = arith.constant dense<0.000000e+00> : vector<8x128xf32>
    %23 = tpu.matmul %0, %22, %cst_13 {dimension_numbers = #tpu.dot_dimension_numbers<[1], [0], [0], [1], [0, 0, 1, 1], [], []>} : vector<8x128xf32>, vector<128x128xf32>, vector<8x128xf32> -> vector<8x128xf32>
    %c0_14 = arith.constant 0 : index
    %c0_15 = arith.constant 0 : index
    %c0_16 = arith.constant 0 : index
    %c0_17 = arith.constant 0 : index
    %24 = vector.load %arg5[%c0_14, %c0_15, %c0_16, %c0_17] : memref<3x4x1x128xf32, #tpu.memory_space<vmem>>, vector<1x1x1x128xf32>
    %25 = vector.shape_cast %24 : vector<1x1x1x128xf32> to vector<1x128xf32>
    %26 = vector.broadcast %25 : vector<1x128xf32> to vector<8x128xf32>
    %27 = arith.addf %23, %26 : vector<8x128xf32>
    %cst_18 = arith.constant 5.000000e-01 : f32
    %28 = vector.broadcast %cst_18 : f32 to vector<8x128xf32>
    %29 = arith.mulf %28, %27 : vector<8x128xf32>
    %cst_19 = arith.constant 0.707106769 : f32
    %30 = vector.broadcast %cst_19 : f32 to vector<8x128xf32>
    %31 = arith.mulf %27, %30 : vector<8x128xf32>
    %32 = math.erf %31 : vector<8x128xf32>
    %cst_20 = arith.constant 1.000000e+00 : f32
    %33 = vector.broadcast %cst_20 : f32 to vector<8x128xf32>
    %34 = arith.addf %33, %32 : vector<8x128xf32>
    %35 = arith.mulf %29, %34 : vector<8x128xf32>
    %c0_21 = arith.constant 0 : index
    %c1 = arith.constant 1 : index
    %c0_22 = arith.constant 0 : index
    %c0_23 = arith.constant 0 : index
    %36 = vector.load %arg4[%c0_21, %c1, %c0_22, %c0_23] : memref<3x2x128x128xf32, #tpu.memory_space<vmem>>, vector<1x1x128x128xf32>
    %37 = vector.shape_cast %36 : vector<1x1x128x128xf32> to vector<128x128xf32>
    %cst_24 = arith.constant dense<0.000000e+00> : vector<8x128xf32>
    %38 = tpu.matmul %35, %37, %cst_24 {dimension_numbers = #tpu.dot_dimension_numbers<[1], [0], [0], [1], [0, 0, 1, 1], [], []>} : vector<8x128xf32>, vector<128x128xf32>, vector<8x128xf32> -> vector<8x128xf32>
    %c0_25 = arith.constant 0 : index
    %c1_26 = arith.constant 1 : index
    %c0_27 = arith.constant 0 : index
    %c0_28 = arith.constant 0 : index
    %39 = vector.load %arg5[%c0_25, %c1_26, %c0_27, %c0_28] : memref<3x4x1x128xf32, #tpu.memory_space<vmem>>, vector<1x1x1x128xf32>
    %40 = vector.shape_cast %39 : vector<1x1x1x128xf32> to vector<1x128xf32>
    %41 = vector.broadcast %40 : vector<1x128xf32> to vector<8x128xf32>
    %42 = arith.addf %38, %41 : vector<8x128xf32>
    %cst_29 = arith.constant 5.000000e-01 : f32
    %43 = vector.broadcast %cst_29 : f32 to vector<8x128xf32>
    %44 = arith.mulf %43, %42 : vector<8x128xf32>
    %cst_30 = arith.constant 0.707106769 : f32
    %45 = vector.broadcast %cst_30 : f32 to vector<8x128xf32>
    %46 = arith.mulf %42, %45 : vector<8x128xf32>
    %47 = math.erf %46 : vector<8x128xf32>
    %cst_31 = arith.constant 1.000000e+00 : f32
    %48 = vector.broadcast %cst_31 : f32 to vector<8x128xf32>
    %49 = arith.addf %48, %47 : vector<8x128xf32>
    %50 = arith.mulf %44, %49 : vector<8x128xf32>
    %c0_32 = arith.constant 0 : index
    %c0_33 = arith.constant 0 : index
    %c0_34 = arith.constant 0 : index
    %51 = vector.load %arg6[%c0_32, %c0_33, %c0_34] : memref<3x128x128xf32, #tpu.memory_space<vmem>>, vector<1x128x128xf32>
    %52 = vector.shape_cast %51 : vector<1x128x128xf32> to vector<128x128xf32>
    %cst_35 = arith.constant dense<0.000000e+00> : vector<8x128xf32>
    %53 = tpu.matmul %0, %52, %cst_35 {dimension_numbers = #tpu.dot_dimension_numbers<[1], [0], [0], [1], [0, 0, 1, 1], [], []>} : vector<8x128xf32>, vector<128x128xf32>, vector<8x128xf32> -> vector<8x128xf32>
    %c0_36 = arith.constant 0 : index
    %c2 = arith.constant 2 : index
    %c0_37 = arith.constant 0 : index
    %c0_38 = arith.constant 0 : index
    %54 = vector.load %arg5[%c0_36, %c2, %c0_37, %c0_38] : memref<3x4x1x128xf32, #tpu.memory_space<vmem>>, vector<1x1x1x128xf32>
    %55 = vector.shape_cast %54 : vector<1x1x1x128xf32> to vector<1x128xf32>
    %56 = vector.broadcast %55 : vector<1x128xf32> to vector<8x128xf32>
    %57 = arith.addf %53, %56 : vector<8x128xf32>
    %58 = arith.addf %50, %57 : vector<8x128xf32>
    %c0_39 = arith.constant 0 : index
    %c0_40 = arith.constant 0 : index
    %c0_41 = arith.constant 0 : index
    %59 = vector.load %arg7[%c0_39, %c0_40, %c0_41] : memref<3x128x128xf32, #tpu.memory_space<vmem>>, vector<1x128x128xf32>
    %60 = vector.shape_cast %59 : vector<1x128x128xf32> to vector<128x128xf32>
    %cst_42 = arith.constant dense<0.000000e+00> : vector<8x128xf32>
    %61 = tpu.matmul %58, %60, %cst_42 {dimension_numbers = #tpu.dot_dimension_numbers<[1], [0], [0], [1], [0, 0, 1, 1], [], []>} : vector<8x128xf32>, vector<128x128xf32>, vector<8x128xf32> -> vector<8x128xf32>
    %c0_43 = arith.constant 0 : index
    %c3 = arith.constant 3 : index
    %c0_44 = arith.constant 0 : index
    %c0_45 = arith.constant 0 : index
    %62 = vector.load %arg5[%c0_43, %c3, %c0_44, %c0_45] : memref<3x4x1x128xf32, #tpu.memory_space<vmem>>, vector<1x1x1x128xf32>
    %63 = vector.shape_cast %62 : vector<1x1x1x128xf32> to vector<1x128xf32>
    %64 = vector.broadcast %63 : vector<1x128xf32> to vector<8x128xf32>
    %65 = arith.addf %61, %64 : vector<8x128xf32>
    %c0_46 = arith.constant 0 : index
    %c0_47 = arith.constant 0 : index
    %c0_48 = arith.constant 0 : index
    %66 = vector.load %arg9[%c0_46, %c0_47, %c0_48] : memref<3x8x128xf32, #tpu.memory_space<vmem>>, vector<1x8x128xf32>
    %67 = vector.shape_cast %66 : vector<1x8x128xf32> to vector<8x128xf32>
    %68 = vector.shape_cast %65 : vector<8x128xf32> to vector<1x8x128xf32>
    tpu.vector_store %arg9[%c0_46, %c0_47, %c0_48], %68 {strides = array<i32>} : memref<3x8x128xf32, #tpu.memory_space<vmem>>, vector<1x8x128xf32>,
    %69 = vector.extract_strided_slice %19 {offsets = [0, 0], sizes = [8, 1], strides = [1, 1]} : vector<8x128xf32> to vector<8x1xf32>
    %70 = vector.broadcast %69 : vector<8x1xf32> to vector<8x128xf32>
    %71 = arith.mulf %70, %65 : vector<8x128xf32>
    %72 = arith.addf %20, %71 : vector<8x128xf32>
    %c1_49 = arith.constant 1 : index
    %c0_50 = arith.constant 0 : index
    %c0_51 = arith.constant 0 : index
    %c0_52 = arith.constant 0 : index
    %73 = vector.load %arg4[%c1_49, %c0_50, %c0_51, %c0_52] : memref<3x2x128x128xf32, #tpu.memory_space<vmem>>, vector<1x1x128x128xf32>
    %74 = vector.shape_cast %73 : vector<1x1x128x128xf32> to vector<128x128xf32>
    %cst_53 = arith.constant dense<0.000000e+00> : vector<8x128xf32>
    %75 = tpu.matmul %0, %74, %cst_53 {dimension_numbers = #tpu.dot_dimension_numbers<[1], [0], [0], [1], [0, 0, 1, 1], [], []>} : vector<8x128xf32>, vector<128x128xf32>, vector<8x128xf32> -> vector<8x128xf32>
    %c1_54 = arith.constant 1 : index
    %c0_55 = arith.constant 0 : index
    %c0_56 = arith.constant 0 : index
    %c0_57 = arith.constant 0 : index
    %76 = vector.load %arg5[%c1_54, %c0_55, %c0_56, %c0_57] : memref<3x4x1x128xf32, #tpu.memory_space<vmem>>, vector<1x1x1x128xf32>
    %77 = vector.shape_cast %76 : vector<1x1x1x128xf32> to vector<1x128xf32>
    %78 = vector.broadcast %77 : vector<1x128xf32> to vector<8x128xf32>
    %79 = arith.addf %75, %78 : vector<8x128xf32>
    %cst_58 = arith.constant 5.000000e-01 : f32
    %80 = vector.broadcast %cst_58 : f32 to vector<8x128xf32>
    %81 = arith.mulf %80, %79 : vector<8x128xf32>
    %cst_59 = arith.constant 0.707106769 : f32
    %82 = vector.broadcast %cst_59 : f32 to vector<8x128xf32>
    %83 = arith.mulf %79, %82 : vector<8x128xf32>
    %84 = math.erf %83 : vector<8x128xf32>
    %cst_60 = arith.constant 1.000000e+00 : f32
    %85 = vector.broadcast %cst_60 : f32 to vector<8x128xf32>
    %86 = arith.addf %85, %84 : vector<8x128xf32>
    %87 = arith.mulf %81, %86 : vector<8x128xf32>
    %c1_61 = arith.constant 1 : index
    %c1_62 = arith.constant 1 : index
    %c0_63 = arith.constant 0 : index
    %c0_64 = arith.constant 0 : index
    %88 = vector.load %arg4[%c1_61, %c1_62, %c0_63, %c0_64] : memref<3x2x128x128xf32, #tpu.memory_space<vmem>>, vector<1x1x128x128xf32>
    %89 = vector.shape_cast %88 : vector<1x1x128x128xf32> to vector<128x128xf32>
    %cst_65 = arith.constant dense<0.000000e+00> : vector<8x128xf32>
    %90 = tpu.matmul %87, %89, %cst_65 {dimension_numbers = #tpu.dot_dimension_numbers<[1], [0], [0], [1], [0, 0, 1, 1], [], []>} : vector<8x128xf32>, vector<128x128xf32>, vector<8x128xf32> -> vector<8x128xf32>
    %c1_66 = arith.constant 1 : index
    %c1_67 = arith.constant 1 : index
    %c0_68 = arith.constant 0 : index
    %c0_69 = arith.constant 0 : index
    %91 = vector.load %arg5[%c1_66, %c1_67, %c0_68, %c0_69] : memref<3x4x1x128xf32, #tpu.memory_space<vmem>>, vector<1x1x1x128xf32>
    %92 = vector.shape_cast %91 : vector<1x1x1x128xf32> to vector<1x128xf32>
    %93 = vector.broadcast %92 : vector<1x128xf32> to vector<8x128xf32>
    %94 = arith.addf %90, %93 : vector<8x128xf32>
    %cst_70 = arith.constant 5.000000e-01 : f32
    %95 = vector.broadcast %cst_70 : f32 to vector<8x128xf32>
    %96 = arith.mulf %95, %94 : vector<8x128xf32>
    %cst_71 = arith.constant 0.707106769 : f32
    %97 = vector.broadcast %cst_71 : f32 to vector<8x128xf32>
    %98 = arith.mulf %94, %97 : vector<8x128xf32>
    %99 = math.erf %98 : vector<8x128xf32>
    %cst_72 = arith.constant 1.000000e+00 : f32
    %100 = vector.broadcast %cst_72 : f32 to vector<8x128xf32>
    %101 = arith.addf %100, %99 : vector<8x128xf32>
    %102 = arith.mulf %96, %101 : vector<8x128xf32>
    %c1_73 = arith.constant 1 : index
    %c0_74 = arith.constant 0 : index
    %c0_75 = arith.constant 0 : index
    %103 = vector.load %arg6[%c1_73, %c0_74, %c0_75] : memref<3x128x128xf32, #tpu.memory_space<vmem>>, vector<1x128x128xf32>
    %104 = vector.shape_cast %103 : vector<1x128x128xf32> to vector<128x128xf32>
    %cst_76 = arith.constant dense<0.000000e+00> : vector<8x128xf32>
    %105 = tpu.matmul %0, %104, %cst_76 {dimension_numbers = #tpu.dot_dimension_numbers<[1], [0], [0], [1], [0, 0, 1, 1], [], []>} : vector<8x128xf32>, vector<128x128xf32>, vector<8x128xf32> -> vector<8x128xf32>
    %c1_77 = arith.constant 1 : index
    %c2_78 = arith.constant 2 : index
    %c0_79 = arith.constant 0 : index
    %c0_80 = arith.constant 0 : index
    %106 = vector.load %arg5[%c1_77, %c2_78, %c0_79, %c0_80] : memref<3x4x1x128xf32, #tpu.memory_space<vmem>>, vector<1x1x1x128xf32>
    %107 = vector.shape_cast %106 : vector<1x1x1x128xf32> to vector<1x128xf32>
    %108 = vector.broadcast %107 : vector<1x128xf32> to vector<8x128xf32>
    %109 = arith.addf %105, %108 : vector<8x128xf32>
    %110 = arith.addf %102, %109 : vector<8x128xf32>
    %c1_81 = arith.constant 1 : index
    %c0_82 = arith.constant 0 : index
    %c0_83 = arith.constant 0 : index
    %111 = vector.load %arg7[%c1_81, %c0_82, %c0_83] : memref<3x128x128xf32, #tpu.memory_space<vmem>>, vector<1x128x128xf32>
    %112 = vector.shape_cast %111 : vector<1x128x128xf32> to vector<128x128xf32>
    %cst_84 = arith.constant dense<0.000000e+00> : vector<8x128xf32>
    %113 = tpu.matmul %110, %112, %cst_84 {dimension_numbers = #tpu.dot_dimension_numbers<[1], [0], [0], [1], [0, 0, 1, 1], [], []>} : vector<8x128xf32>, vector<128x128xf32>, vector<8x128xf32> -> vector<8x128xf32>
    %c1_85 = arith.constant 1 : index
    %c3_86 = arith.constant 3 : index
    %c0_87 = arith.constant 0 : index
    %c0_88 = arith.constant 0 : index
    %114 = vector.load %arg5[%c1_85, %c3_86, %c0_87, %c0_88] : memref<3x4x1x128xf32, #tpu.memory_space<vmem>>, vector<1x1x1x128xf32>
    %115 = vector.shape_cast %114 : vector<1x1x1x128xf32> to vector<1x128xf32>
    %116 = vector.broadcast %115 : vector<1x128xf32> to vector<8x128xf32>
    %117 = arith.addf %113, %116 : vector<8x128xf32>
    %c1_89 = arith.constant 1 : index
    %c0_90 = arith.constant 0 : index
    %c0_91 = arith.constant 0 : index
    %118 = vector.load %arg9[%c1_89, %c0_90, %c0_91] : memref<3x8x128xf32, #tpu.memory_space<vmem>>, vector<1x8x128xf32>
    %119 = vector.shape_cast %118 : vector<1x8x128xf32> to vector<8x128xf32>
    %120 = vector.shape_cast %117 : vector<8x128xf32> to vector<1x8x128xf32>
    tpu.vector_store %arg9[%c1_89, %c0_90, %c0_91], %120 {strides = array<i32>} : memref<3x8x128xf32, #tpu.memory_space<vmem>>, vector<1x8x128xf32>,
    %121 = vector.extract_strided_slice %19 {offsets = [0, 1], sizes = [8, 1], strides = [1, 1]} : vector<8x128xf32> to vector<8x1xf32>
    %122 = vector.broadcast %121 : vector<8x1xf32> to vector<8x128xf32>
    %123 = arith.mulf %122, %117 : vector<8x128xf32>
    %124 = arith.addf %72, %123 : vector<8x128xf32>
    %c2_92 = arith.constant 2 : index
    %c0_93 = arith.constant 0 : index
    %c0_94 = arith.constant 0 : index
    %c0_95 = arith.constant 0 : index
    %125 = vector.load %arg4[%c2_92, %c0_93, %c0_94, %c0_95] : memref<3x2x128x128xf32, #tpu.memory_space<vmem>>, vector<1x1x128x128xf32>
    %126 = vector.shape_cast %125 : vector<1x1x128x128xf32> to vector<128x128xf32>
    %cst_96 = arith.constant dense<0.000000e+00> : vector<8x128xf32>
    %127 = tpu.matmul %0, %126, %cst_96 {dimension_numbers = #tpu.dot_dimension_numbers<[1], [0], [0], [1], [0, 0, 1, 1], [], []>} : vector<8x128xf32>, vector<128x128xf32>, vector<8x128xf32> -> vector<8x128xf32>
    %c2_97 = arith.constant 2 : index
    %c0_98 = arith.constant 0 : index
    %c0_99 = arith.constant 0 : index
    %c0_100 = arith.constant 0 : index
    %128 = vector.load %arg5[%c2_97, %c0_98, %c0_99, %c0_100] : memref<3x4x1x128xf32, #tpu.memory_space<vmem>>, vector<1x1x1x128xf32>
    %129 = vector.shape_cast %128 : vector<1x1x1x128xf32> to vector<1x128xf32>
    %130 = vector.broadcast %129 : vector<1x128xf32> to vector<8x128xf32>
    %131 = arith.addf %127, %130 : vector<8x128xf32>
    %cst_101 = arith.constant 5.000000e-01 : f32
    %132 = vector.broadcast %cst_101 : f32 to vector<8x128xf32>
    %133 = arith.mulf %132, %131 : vector<8x128xf32>
    %cst_102 = arith.constant 0.707106769 : f32
    %134 = vector.broadcast %cst_102 : f32 to vector<8x128xf32>
    %135 = arith.mulf %131, %134 : vector<8x128xf32>
    %136 = math.erf %135 : vector<8x128xf32>
    %cst_103 = arith.constant 1.000000e+00 : f32
    %137 = vector.broadcast %cst_103 : f32 to vector<8x128xf32>
    %138 = arith.addf %137, %136 : vector<8x128xf32>
    %139 = arith.mulf %133, %138 : vector<8x128xf32>
    %c2_104 = arith.constant 2 : index
    %c1_105 = arith.constant 1 : index
    %c0_106 = arith.constant 0 : index
    %c0_107 = arith.constant 0 : index
    %140 = vector.load %arg4[%c2_104, %c1_105, %c0_106, %c0_107] : memref<3x2x128x128xf32, #tpu.memory_space<vmem>>, vector<1x1x128x128xf32>
    %141 = vector.shape_cast %140 : vector<1x1x128x128xf32> to vector<128x128xf32>
    %cst_108 = arith.constant dense<0.000000e+00> : vector<8x128xf32>
    %142 = tpu.matmul %139, %141, %cst_108 {dimension_numbers = #tpu.dot_dimension_numbers<[1], [0], [0], [1], [0, 0, 1, 1], [], []>} : vector<8x128xf32>, vector<128x128xf32>, vector<8x128xf32> -> vector<8x128xf32>
    %c2_109 = arith.constant 2 : index
    %c1_110 = arith.constant 1 : index
    %c0_111 = arith.constant 0 : index
    %c0_112 = arith.constant 0 : index
    %143 = vector.load %arg5[%c2_109, %c1_110, %c0_111, %c0_112] : memref<3x4x1x128xf32, #tpu.memory_space<vmem>>, vector<1x1x1x128xf32>
    %144 = vector.shape_cast %143 : vector<1x1x1x128xf32> to vector<1x128xf32>
    %145 = vector.broadcast %144 : vector<1x128xf32> to vector<8x128xf32>
    %146 = arith.addf %142, %145 : vector<8x128xf32>
    %cst_113 = arith.constant 5.000000e-01 : f32
    %147 = vector.broadcast %cst_113 : f32 to vector<8x128xf32>
    %148 = arith.mulf %147, %146 : vector<8x128xf32>
    %cst_114 = arith.constant 0.707106769 : f32
    %149 = vector.broadcast %cst_114 : f32 to vector<8x128xf32>
    %150 = arith.mulf %146, %149 : vector<8x128xf32>
    %151 = math.erf %150 : vector<8x128xf32>
    %cst_115 = arith.constant 1.000000e+00 : f32
    %152 = vector.broadcast %cst_115 : f32 to vector<8x128xf32>
    %153 = arith.addf %152, %151 : vector<8x128xf32>
    %154 = arith.mulf %148, %153 : vector<8x128xf32>
    %c2_116 = arith.constant 2 : index
    %c0_117 = arith.constant 0 : index
    %c0_118 = arith.constant 0 : index
    %155 = vector.load %arg6[%c2_116, %c0_117, %c0_118] : memref<3x128x128xf32, #tpu.memory_space<vmem>>, vector<1x128x128xf32>
    %156 = vector.shape_cast %155 : vector<1x128x128xf32> to vector<128x128xf32>
    %cst_119 = arith.constant dense<0.000000e+00> : vector<8x128xf32>
    %157 = tpu.matmul %0, %156, %cst_119 {dimension_numbers = #tpu.dot_dimension_numbers<[1], [0], [0], [1], [0, 0, 1, 1], [], []>} : vector<8x128xf32>, vector<128x128xf32>, vector<8x128xf32> -> vector<8x128xf32>
    %c2_120 = arith.constant 2 : index
    %c2_121 = arith.constant 2 : index
    %c0_122 = arith.constant 0 : index
    %c0_123 = arith.constant 0 : index
    %158 = vector.load %arg5[%c2_120, %c2_121, %c0_122, %c0_123] : memref<3x4x1x128xf32, #tpu.memory_space<vmem>>, vector<1x1x1x128xf32>
    %159 = vector.shape_cast %158 : vector<1x1x1x128xf32> to vector<1x128xf32>
    %160 = vector.broadcast %159 : vector<1x128xf32> to vector<8x128xf32>
    %161 = arith.addf %157, %160 : vector<8x128xf32>
    %162 = arith.addf %154, %161 : vector<8x128xf32>
    %c2_124 = arith.constant 2 : index
    %c0_125 = arith.constant 0 : index
    %c0_126 = arith.constant 0 : index
    %163 = vector.load %arg7[%c2_124, %c0_125, %c0_126] : memref<3x128x128xf32, #tpu.memory_space<vmem>>, vector<1x128x128xf32>
    %164 = vector.shape_cast %163 : vector<1x128x128xf32> to vector<128x128xf32>
    %cst_127 = arith.constant dense<0.000000e+00> : vector<8x128xf32>
    %165 = tpu.matmul %162, %164, %cst_127 {dimension_numbers = #tpu.dot_dimension_numbers<[1], [0], [0], [1], [0, 0, 1, 1], [], []>} : vector<8x128xf32>, vector<128x128xf32>, vector<8x128xf32> -> vector<8x128xf32>
    %c2_128 = arith.constant 2 : index
    %c3_129 = arith.constant 3 : index
    %c0_130 = arith.constant 0 : index
    %c0_131 = arith.constant 0 : index
    %166 = vector.load %arg5[%c2_128, %c3_129, %c0_130, %c0_131] : memref<3x4x1x128xf32, #tpu.memory_space<vmem>>, vector<1x1x1x128xf32>
    %167 = vector.shape_cast %166 : vector<1x1x1x128xf32> to vector<1x128xf32>
    %168 = vector.broadcast %167 : vector<1x128xf32> to vector<8x128xf32>
    %169 = arith.addf %165, %168 : vector<8x128xf32>
    %c2_132 = arith.constant 2 : index
    %c0_133 = arith.constant 0 : index
    %c0_134 = arith.constant 0 : index
    %170 = vector.load %arg9[%c2_132, %c0_133, %c0_134] : memref<3x8x128xf32, #tpu.memory_space<vmem>>, vector<1x8x128xf32>
    %171 = vector.shape_cast %170 : vector<1x8x128xf32> to vector<8x128xf32>
    %172 = vector.shape_cast %169 : vector<8x128xf32> to vector<1x8x128xf32>
    tpu.vector_store %arg9[%c2_132, %c0_133, %c0_134], %172 {strides = array<i32>} : memref<3x8x128xf32, #tpu.memory_space<vmem>>, vector<1x8x128xf32>,
    %173 = vector.extract_strided_slice %19 {offsets = [0, 2], sizes = [8, 1], strides = [1, 1]} : vector<8x128xf32> to vector<8x1xf32>
    %174 = vector.broadcast %173 : vector<8x1xf32> to vector<8x128xf32>
    %175 = arith.mulf %174, %169 : vector<8x128xf32>
    %176 = arith.addf %124, %175 : vector<8x128xf32>
    %c0_135 = arith.constant 0 : index
    %c0_136 = arith.constant 0 : index
    %177 = vector.load %arg8[%c0_135, %c0_136] : memref<8x128xf32, #tpu.memory_space<vmem>>, vector<8x128xf32>
    tpu.vector_store %arg8[%c0_135, %c0_136], %176 {strides = array<i32>} : memref<8x128xf32, #tpu.memory_space<vmem>>, vector<8x128xf32>,
    return
  }
  func.func @transform_0(%arg0: i32) -> (i32, i32) {
    %c0_i32 = arith.constant 0 : i32
    %c0_i32_0 = arith.constant 0 : i32
    return %arg0, %c0_i32 : i32, i32
  }
  func.func @transform_1(%arg0: i32) -> (i32, i32) {
    %c0_i32 = arith.constant 0 : i32
    %c0_i32_0 = arith.constant 0 : i32
    %c0_i32_1 = arith.constant 0 : i32
    return %c0_i32, %c0_i32_0 : i32, i32
  }
  func.func @transform_2(%arg0: i32) -> (i32, i32) {
    %c0_i32 = arith.constant 0 : i32
    %c0_i32_0 = arith.constant 0 : i32
    %c0_i32_1 = arith.constant 0 : i32
    return %c0_i32, %c0_i32_0 : i32, i32
  }
  func.func @transform_3(%arg0: i32) -> (i32, i32, i32, i32) {
    %c0_i32 = arith.constant 0 : i32
    %c0_i32_0 = arith.constant 0 : i32
    %c0_i32_1 = arith.constant 0 : i32
    %c0_i32_2 = arith.constant 0 : i32
    %c0_i32_3 = arith.constant 0 : i32
    return %c0_i32, %c0_i32_0, %c0_i32_1, %c0_i32_2 : i32, i32, i32, i32
  }
  func.func @transform_4(%arg0: i32) -> (i32, i32, i32, i32) {
    %c0_i32 = arith.constant 0 : i32
    %c0_i32_0 = arith.constant 0 : i32
    %c0_i32_1 = arith.constant 0 : i32
    %c0_i32_2 = arith.constant 0 : i32
    %c0_i32_3 = arith.constant 0 : i32
    return %c0_i32, %c0_i32_0, %c0_i32_1, %c0_i32_2 : i32, i32, i32, i32
  }
  func.func @transform_5(%arg0: i32) -> (i32, i32, i32) {
    %c0_i32 = arith.constant 0 : i32
    %c0_i32_0 = arith.constant 0 : i32
    %c0_i32_1 = arith.constant 0 : i32
    %c0_i32_2 = arith.constant 0 : i32
    return %c0_i32, %c0_i32_0, %c0_i32_1 : i32, i32, i32
  }
  func.func @transform_6(%arg0: i32) -> (i32, i32, i32) {
    %c0_i32 = arith.constant 0 : i32
    %c0_i32_0 = arith.constant 0 : i32
    %c0_i32_1 = arith.constant 0 : i32
    %c0_i32_2 = arith.constant 0 : i32
    return %c0_i32, %c0_i32_0, %c0_i32_1 : i32, i32, i32
  }
  func.func @transform_7(%arg0: i32) -> (i32, i32) {
    %c0_i32 = arith.constant 0 : i32
    %c0_i32_0 = arith.constant 0 : i32
    return %arg0, %c0_i32 : i32, i32
  }
  func.func @transform_8(%arg0: i32) -> (i32, i32, i32) {
    %c0_i32 = arith.constant 0 : i32
    %c0_i32_0 = arith.constant 0 : i32
    %c0_i32_1 = arith.constant 0 : i32
    return %c0_i32, %arg0, %c0_i32_0 : i32, i32, i32
  }
}

</mosaic_0001>

<bundles_post_ra>
// kernel: _expert_head_fwd.1
= control target key start
LH: loop header
LB: loop body
LE: loop exit
PB: predicated region body
PF: predicated region fallthrough
CT: control target
= control target key end

     0   :  { %14 = vsyncpa [#allocation3], 0  ;;  %s2928_s0 = inlined_call_operand.vmem [shape: f32[8,128], index: 0, kind: input, shape index: {}]   ;;  %s2929_s1 = inlined_call_operand.hbm [shape: f32[128,128], index: 1, kind: input, shape index: {}]   ;;  %s2930_s2 = inlined_call_operand.vmem [shape: f32[1,128], index: 2, kind: input, shape index: {}]   ;;  %s2931_s3 = inlined_call_operand.hbm [shape: f32[3,2,128,128], index: 3, kind: input, shape index: {}]   ;;  %s2932_s4 = inlined_call_operand.vmem [shape: f32[3,4,1,128], index: 4, kind: input, shape index: {}]   ;;  %s2933_s5 = inlined_call_operand.hbm [shape: f32[3,128,128], index: 5, kind: input, shape index: {}]   ;;  %s2934_s6 = inlined_call_operand.hbm [shape: f32[3,128,128], index: 6, kind: input, shape index: {}]   ;;  %s2935_s7 = inlined_call_operand.hbm [shape: f32[8,128], index: 7, kind: output, shape index: {0}]   ;;  %s2936_s8 = inlined_call_operand.vmem [shape: f32[3,8,128], index: 8, kind: output, shape index: {1}]  }
   0x1   :  { %15 = vsyncpa [#allocation6], 0 }
   0x2   :  { %16 = vsyncpa [#allocation9], 0 }
   0x3   :  { %17 = vsyncpa [#allocation4], 0  ;;  %s2570_s27 = smov [#allocation5]   ;;  %s2571_s29 = smov [#allocation2]  }
   0x4   :  { %s39_s28 = sshll.u32 %s2570_s27, 4  ;;  %s25_s30 = sshll.u32 %s2571_s29, 4  ;;  %s40_s28 = int_to_ptr.vmem [resolvable:$true] %s39_s28  ;;  %s2628_s30 = int_to_ptr.vmem [resolvable:$true] %s25_s30 }
   0x5   :  { %s2452_s11 = scalar_lea.hbm %s2931_s3, 12288 }
   0x6   :  { %p2453_p0 = scmp.ne.s32.totalorder %s2931_s3, %s2452_s11  ;;  %p2456_p1 = scmp.lt.u32.totalorder %s2452_s11, %s2931_s3 }
   0x8   :  { %p2458_p2 = pnand %p2456_p1, %p2453_p0 }
   0xa   :  { %2461 = shalt.err (!%p2458_p2)
}
   0xb   :  { %s2462_s16 = scalar_lea.vmem %s40_s28, 12288  ;;  %p2467_p4 = scmp.lt.s32.totalorder %s40_s28, %s40_s28 }
   0xc   :  { %p2463_p3 = scmp.ne.s32.totalorder %s40_s28, %s2462_s16  ;;  %p2468_p5 = scmp.lt.s32.totalorder %s2462_s16, %s2462_s16 }
   0xe   :  { %p2469_p6 = por %p2468_p5, %p2467_p4 }
  0x10   :  { %p2470_p7 = pnand %p2469_p6, %p2463_p3 }
  0x12   :  { %2473 = shalt.err (!%p2470_p7)
}
  0x13   :  { %s2572_s17 = smov 128   ;;  %s2573_s18 = smov 8  }
  0x14   :  { %45 = dma.hbm_to_vmem [thread:$0]  %s2931_s3, 12288, %s40_s28, [#allocation6], %s2572_s17, %s2572_s17, %s2573_s18  }
  0x15   :  { %s2474_s23 = scalar_lea.hbm %s2929_s1, 2048 }
  0x16   :  { %p2475_p8 = scmp.ne.s32.totalorder %s2929_s1, %s2474_s23  ;;  %p2478_p9 = scmp.lt.u32.totalorder %s2474_s23, %s2929_s1 }
  0x18   :  { %p2480_p10 = pnand %p2478_p9, %p2475_p8 }
  0x1a   :  { %2483 = shalt.err (!%p2480_p10)
}
  0x1b   :  { %s2484_s29 = scalar_lea.vmem %s2628_s30, 2048  ;;  %p2489_p12 = scmp.lt.s32.totalorder %s2628_s30, %s2628_s30 }
  0x1c   :  { %p2485_p11 = scmp.ne.s32.totalorder %s2628_s30, %s2484_s29  ;;  %p2490_p13 = scmp.lt.s32.totalorder %s2484_s29, %s2484_s29 }
  0x1e   :  { %p2491_p0 = por %p2490_p13, %p2489_p12 }
  0x20   :  { %p2492_p1 = pnand %p2491_p0, %p2485_p11 }
  0x22   :  { %2495 = shalt.err (!%p2492_p1)
}
  0x23   :  { %31 = dma.hbm_to_vmem [thread:$0]  %s2929_s1, 2048, %s2628_s30, [#allocation3], %s2572_s17, %s2572_s17, %s2573_s18  }
  0x24   :  { %s2574_s9 = smov [#allocation7]   ;;  %s2575_s11 = smov [#allocation8]  }
  0x25   :  { %s53_s10 = sshll.u32 %s2574_s9, 4  ;;  %s65_s12 = sshll.u32 %s2575_s11, 4  ;;  %s54_s10 = int_to_ptr.vmem [resolvable:$true] %s53_s10  ;;  %s2665_s12 = int_to_ptr.vmem [resolvable:$true] %s65_s12 }
  0x26   :  { %s2496_s15 = scalar_lea.hbm %s2933_s5, 6144 }
  0x27   :  { %p2497_p2 = scmp.ne.s32.totalorder %s2933_s5, %s2496_s15  ;;  %p2500_p3 = scmp.lt.u32.totalorder %s2496_s15, %s2933_s5 }
  0x29   :  { %p2502_p4 = pnand %p2500_p3, %p2497_p2 }
  0x2b   :  { %2505 = shalt.err (!%p2502_p4)
}
  0x2c   :  { %s2506_s1 = scalar_lea.vmem %s54_s10, 6144  ;;  %p2511_p6 = scmp.lt.s32.totalorder %s54_s10, %s54_s10 }
  0x2d   :  { %p2507_p5 = scmp.ne.s32.totalorder %s54_s10, %s2506_s1  ;;  %p2512_p7 = scmp.lt.s32.totalorder %s2506_s1, %s2506_s1 }
  0x2f   :  { %p2513_p8 = por %p2512_p7, %p2511_p6 }
  0x31   :  { %p2514_p9 = pnand %p2513_p8, %p2507_p5 }
  0x33   :  { %2517 = shalt.err (!%p2514_p9)
}
  0x34   :  { %59 = dma.hbm_to_vmem [thread:$0]  %s2933_s5, 6144, %s54_s10, [#allocation6], %s2572_s17, %s2572_s17, %s2573_s18  }
  0x35   :  { %s2518_s25 = scalar_lea.hbm %s2934_s6, 6144 }
  0x36   :  { %p2519_p10 = scmp.ne.s32.totalorder %s2934_s6, %s2518_s25  ;;  %p2522_p11 = scmp.lt.u32.totalorder %s2518_s25, %s2934_s6 }
  0x38   :  { %p2524_p12 = pnand %p2522_p11, %p2519_p10 }
  0x3a   :  { %2527 = shalt.err (!%p2524_p12)
}
  0x3b   :  { %s2528_s28 = scalar_lea.vmem %s2665_s12, 6144  ;;  %p2533_p0 = scmp.lt.s32.totalorder %s2665_s12, %s2665_s12 }
  0x3c   :  { %p2529_p13 = scmp.ne.s32.totalorder %s2665_s12, %s2528_s28  ;;  %p2534_p1 = scmp.lt.s32.totalorder %s2528_s28, %s2528_s28 }
  0x3e   :  { %p2535_p2 = por %p2534_p1, %p2533_p0 }
  0x40   :  { %p2536_p3 = pnand %p2535_p2, %p2529_p13 }
  0x42   :  { %2539 = shalt.err (!%p2536_p3)
}
  0x43   :  { %71 = dma.hbm_to_vmem [thread:$0]  %s2934_s6, 6144, %s2665_s12, [#allocation9], %s2572_s17, %s2572_s17, %s2573_s18  }
  0x44   :  { %2562 = dma.done.wait [#allocation3], 2048  }
  0x45   :  { %2563 = vsyncadd [#allocation3], 4294965248 }
  0x46   :  { %2564 = dma.done.wait [#allocation6], 18432  }
  0x47   :  { %2565 = vsyncadd [#allocation6], 4294948864 }
  0x48   :  { %2566 = dma.done.wait [#allocation9], 6144  }
  0x49   :  { %2567 = vsyncadd [#allocation9], 4294961152  ;;  %v2576_v0 = vmov 0.0|0.0   ;;  %vm2577_vm0 = vmmov 0   ;;  %v2578_v1 = vmov 0.0   ;;  %v85_v2 = vld [vmem:[#allocation2] sm:$0xff] }
  0x4a   :  { %2108 = vmatprep.subr.bf16.mxu0 %v2576_v0  ;;  %2132 = vmatprep.subr.bf16.mxu1 %v2576_v0  ;;  %v86_v3 = vld [vmem:[#allocation2 + $0x8] sm:$0xff]  ;;  %v191_v4 = vld [vmem:[#allocation5] sm:$0xff]  ;;  %v87_v7 = vld [vmem:[#allocation2 + $0x10] sm:$0xff]  ;;  %s2582_s10 = smov [#allocation10]  }
  0x4b   :  { %1685 = vmatprep.mubr.msk.f32.mxu0 %vm2577_vm0, %v2578_v1  ;;  %1720 = vmatprep.mubr.msk.f32.mxu1 %vm2577_vm0, %v2578_v1  ;;  %v2109_v5 = vpack.c.bf16 %v86_v3, %v85_v2  ;;  %v192_v6 = vld [vmem:[#allocation5 + $0x8] sm:$0xff]  ;;  %v88_v8 = vld [vmem:[#allocation2 + $0x18] sm:$0xff]  ;;  %v193_v10 = vld [vmem:[#allocation5 + $0x10] sm:$0xff]  ;;  %s1391_s11 = sshll.u32 %s2582_s10, 4  ;;  %s1392_s11 = int_to_ptr.vmem [resolvable:$true] %s1391_s11 }
  0x4c   :  { %v2133_v9 = vpack.c.bf16 %v192_v6, %v191_v4  ;;  %v194_v11 = vld [vmem:[#allocation5 + $0x18] sm:$0xff]  ;;  %v2112_v12 = vpack.c.bf16 %v88_v8, %v87_v7  ;;  %v89_v14 = vld [vmem:[#allocation2 + $0x20] sm:$0xff]  ;;  %v90_v15 = vld [vmem:[#allocation2 + $0x28] sm:$0xff]  ;;  %s2540_s13 = scalar_lea.vmem %s1392_s11, 128  ;;  %p2545_p5 = scmp.lt.s32.totalorder %s1392_s11, %s1392_s11 }
  0x4d   :  { %2110 = vmatpush3.bf16.msra.mxu0 %v2109_v5  ;;  %v2136_v13 = vpack.c.bf16 %v194_v11, %v193_v10  ;;  %v195_v16 = vld [vmem:[#allocation5 + $0x20] sm:$0xff]  ;;  %v196_v17 = vld [vmem:[#allocation5 + $0x28] sm:$0xff]  ;;  %v2115_v18 = vpack.c.bf16 %v90_v15, %v89_v14  ;;  %v91_v20 = vld [vmem:[#allocation2 + $0x30] sm:$0xff]  ;;  %p2541_p4 = scmp.ne.s32.totalorder %s1392_s11, %s2540_s13  ;;  %p2546_p6 = scmp.lt.s32.totalorder %s2540_s13, %s2540_s13 }
  0x4e   :  { %2134 = vmatpush3.bf16.msra.mxu1 %v2133_v9  ;;  %2111 = vmatprep.subr.bf16.mxu0 %v2576_v0  ;;  %v2139_v19 = vpack.c.bf16 %v196_v17, %v195_v16  ;;  %v92_v21 = vld [vmem:[#allocation2 + $0x38] sm:$0xff]  ;;  %v197_v22 = vld [vmem:[#allocation5 + $0x30] sm:$0xff]  ;;  %v93_v26 = vld [vmem:[#allocation2 + $0x40] sm:$0xff] }
  0x4f   :  { %2135 = vmatprep.subr.bf16.mxu1 %v2576_v0  ;;  %v198_v23 = vld [vmem:[#allocation5 + $0x38] sm:$0xff]  ;;  %v2118_v24 = vpack.c.bf16 %v92_v21, %v91_v20  ;;  %v94_v27 = vld [vmem:[#allocation2 + $0x48] sm:$0xff]  ;;  %v199_v28 = vld [vmem:[#allocation5 + $0x40] sm:$0xff]  ;;  %p2547_p7 = por %p2546_p6, %p2545_p5 }
  0x50   :  { %v2142_v25 = vpack.c.bf16 %v198_v23, %v197_v22  ;;  %v200_v29 = vld [vmem:[#allocation5 + $0x48] sm:$0xff]  ;;  %v2121_v30 = vpack.c.bf16 %v94_v27, %v93_v26  ;;  %v95_v32 = vld [vmem:[#allocation2 + $0x50] sm:$0xff]  ;;  %v96_v33 = vld [vmem:[#allocation2 + $0x58] sm:$0xff] }
  0x51   :  { %2113 = vmatpush3.bf16.msra.mxu0 %v2112_v12  ;;  %v2145_v31 = vpack.c.bf16 %v200_v29, %v199_v28  ;;  %v201_v34 = vld [vmem:[#allocation5 + $0x50] sm:$0xff]  ;;  %v202_v35 = vld [vmem:[#allocation5 + $0x58] sm:$0xff]  ;;  %v2124_v36 = vpack.c.bf16 %v96_v33, %v95_v32  ;;  %v97_v38 = vld [vmem:[#allocation2 + $0x60] sm:$0xff]  ;;  %p2548_p8 = pnand %p2547_p7, %p2541_p4 }
  0x52   :  { %2137 = vmatpush3.bf16.msra.mxu1 %v2136_v13  ;;  %2114 = vmatprep.subr.bf16.mxu0 %v2576_v0  ;;  %v2148_v37 = vpack.c.bf16 %v202_v35, %v201_v34  ;;  %v98_v39 = vld [vmem:[#allocation2 + $0x68] sm:$0xff]  ;;  %v203_v40 = vld [vmem:[#allocation5 + $0x60] sm:$0xff]  ;;  %v99_v44 = vld [vmem:[#allocation2 + $0x70] sm:$0xff] }
  0x53   :  { %2138 = vmatprep.subr.bf16.mxu1 %v2576_v0  ;;  %v204_v41 = vld [vmem:[#allocation5 + $0x68] sm:$0xff]  ;;  %v2127_v42 = vpack.c.bf16 %v98_v39, %v97_v38  ;;  %v100_v45 = vld [vmem:[#allocation2 + $0x78] sm:$0xff]  ;;  %v205_v46 = vld [vmem:[#allocation5 + $0x70] sm:$0xff] }
  0x54   :  { %v2151_v43 = vpack.c.bf16 %v204_v41, %v203_v40  ;;  %v206_v47 = vld [vmem:[#allocation5 + $0x78] sm:$0xff]  ;;  %v2130_v48 = vpack.c.bf16 %v100_v45, %v99_v44  ;;  %v290_v50 = vld [vmem:[#allocation5 + $0x80] sm:$0xff]  ;;  %v291_v51 = vld [vmem:[#allocation5 + $0x88] sm:$0xff] }
  0x55   :  { %2116 = vmatpush3.bf16.msra.mxu0 %v2115_v18  ;;  %v2154_v49 = vpack.c.bf16 %v206_v47, %v205_v46  ;;  %v389_v52 = vld [vmem:[#allocation7] sm:$0xff]  ;;  %v390_v53 = vld [vmem:[#allocation7 + $0x8] sm:$0xff]  ;;  %v2157_v55 = vpack.c.bf16 %v291_v51, %v290_v50  ;;  %v292_v57 = vld [vmem:[#allocation5 + $0x90] sm:$0xff] }
  0x56   :  { %2140 = vmatpush3.bf16.msra.mxu1 %v2139_v19  ;;  %2117 = vmatprep.subr.bf16.mxu0 %v2576_v0  ;;  %v2725_v54 = vld [vmem:[%s2928_s0] sm:$0xff]  ;;  %v2181_v56 = vpack.c.bf16 %v390_v53, %v389_v52  ;;  %v293_v58 = vld [vmem:[#allocation5 + $0x98] sm:$0xff]  ;;  %v391_v59 = vld [vmem:[#allocation7 + $0x10] sm:$0xff] }
  0x57   :  { %2141 = vmatprep.subr.bf16.mxu1 %v2576_v0  ;;  %v392_v60 = vld [vmem:[#allocation7 + $0x18] sm:$0xff]  ;;  %v2160_v61 = vpack.c.bf16 %v293_v58, %v292_v57  ;;  %v294_v63 = vld [vmem:[#allocation5 + $0xa0] sm:$0xff]  ;;  %v295_v2 = vld [vmem:[#allocation5 + $0xa8] sm:$0xff] }
  0x58   :  { %v2184_v62 = vpack.c.bf16 %v392_v60, %v391_v59  ;;  %v393_v3 = vld [vmem:[#allocation7 + $0x20] sm:$0xff]  ;;  %v394_v4 = vld [vmem:[#allocation7 + $0x28] sm:$0xff]  ;;  %v2163_v5 = vpack.c.bf16 %v295_v2, %v294_v63  ;;  %v395_v7 = vld [vmem:[#allocation7 + $0x30] sm:$0xff] }
  0x59   :  { %2119 = vmatpush3.bf16.msra.mxu0 %v2118_v24  ;;  %v2187_v6 = vpack.c.bf16 %v394_v4, %v393_v3  ;;  %v396_v8 = vld [vmem:[#allocation7 + $0x38] sm:$0xff]  ;;  %v397_v10 = vld [vmem:[#allocation7 + $0x40] sm:$0xff]  ;;  %v398_v11 = vld [vmem:[#allocation7 + $0x48] sm:$0xff] }
  0x5a   :  { %2143 = vmatpush3.bf16.msra.mxu1 %v2142_v25  ;;  %2120 = vmatprep.subr.bf16.mxu0 %v2576_v0  ;;  %v2190_v9 = vpack.c.bf16 %v396_v8, %v395_v7  ;;  %v2193_v12 = vpack.c.bf16 %v398_v11, %v397_v10  ;;  %v399_v13 = vld [vmem:[#allocation7 + $0x50] sm:$0xff]  ;;  %v400_v14 = vld [vmem:[#allocation7 + $0x58] sm:$0xff]  ;;  %v401_v18 = vld [vmem:[#allocation7 + $0x60] sm:$0xff] }
  0x5b   :  { %2144 = vmatprep.subr.bf16.mxu1 %v2576_v0  ;;  %v2196_v15 = vpack.c.bf16 %v400_v14, %v399_v13  ;;  %v296_v16 = vld [vmem:[#allocation5 + $0xb0] sm:$0xff]  ;;  %v297_v17 = vld [vmem:[#allocation5 + $0xb8] sm:$0xff]  ;;  %v402_v20 = vld [vmem:[#allocation7 + $0x68] sm:$0xff] }
  0x5c   :  { %v2166_v19 = vpack.c.bf16 %v297_v17, %v296_v16  ;;  %v2199_v21 = vpack.c.bf16 %v402_v20, %v401_v18  ;;  %v298_v22 = vld [vmem:[#allocation5 + $0xc0] sm:$0xff]  ;;  %v299_v23 = vld [vmem:[#allocation5 + $0xc8] sm:$0xff]  ;;  %v403_v24 = vld [vmem:[#allocation7 + $0x70] sm:$0xff] }
  0x5d   :  { %2122 = vmatpush3.bf16.msra.mxu0 %v2121_v30  ;;  %v2169_v25 = vpack.c.bf16 %v299_v23, %v298_v22  ;;  %v404_v26 = vld [vmem:[#allocation7 + $0x78] sm:$0xff]  ;;  %v300_v28 = vld [vmem:[#allocation5 + $0xd0] sm:$0xff]  ;;  %v587_v30 = vld [vmem:[#allocation5 + $0x100] sm:$0xff] }
  0x5e   :  { %2146 = vmatpush3.bf16.msra.mxu1 %v2145_v31  ;;  %2123 = vmatprep.subr.bf16.mxu0 %v2576_v0  ;;  %v2202_v27 = vpack.c.bf16 %v404_v26, %v403_v24  ;;  %v301_v29 = vld [vmem:[#allocation5 + $0xd8] sm:$0xff]  ;;  %v588_v32 = vld [vmem:[#allocation5 + $0x108] sm:$0xff]  ;;  %v302_v34 = vld [vmem:[#allocation5 + $0xe0] sm:$0xff] }
  0x5f   :  { %2147 = vmatprep.subr.bf16.mxu1 %v2576_v0  ;;  %v2172_v31 = vpack.c.bf16 %v301_v29, %v300_v28  ;;  %v2229_v33 = vpack.c.bf16 %v588_v32, %v587_v30  ;;  %v303_v35 = vld [vmem:[#allocation5 + $0xe8] sm:$0xff]  ;;  %v590_v38 = vld [vmem:[#allocation5 + $0x118] sm:$0xff]  ;;  %v304_v40 = vld [vmem:[#allocation5 + $0xf0] sm:$0xff] }
  0x60   :  { %v305_v41 = vld [vmem:[#allocation5 + $0xf8] sm:$0xff]  ;;  %v592_v44 = vld [vmem:[#allocation5 + $0x128] sm:$0xff]  ;;  %v593_v46 = vld [vmem:[#allocation5 + $0x130] sm:$0xff] }
  0x61   :  { %2125 = vmatpush3.bf16.msra.mxu0 %v2124_v36  ;;  %v589_v36 = vld [vmem:[#allocation5 + $0x110] sm:$0xff]  ;;  %v594_v47 = vld [vmem:[#allocation5 + $0x138] sm:$0xff]  ;;  %v596_v50 = vld [vmem:[#allocation5 + $0x148] sm:$0xff] }
  0x62   :  { %2149 = vmatpush3.bf16.msra.mxu1 %v2148_v37  ;;  %2126 = vmatprep.subr.bf16.mxu0 %v2576_v0  ;;  %v2175_v37 = vpack.c.bf16 %v303_v35, %v302_v34  ;;  %v2232_v39 = vpack.c.bf16 %v590_v38, %v589_v36  ;;  %v597_v52 = vld [vmem:[#allocation5 + $0x150] sm:$0xff]  ;;  %v598_v53 = vld [vmem:[#allocation5 + $0x158] sm:$0xff]  ;;  %v600_v57 = vld [vmem:[#allocation5 + $0x168] sm:$0xff] }
  0x63   :  { %2150 = vmatprep.subr.bf16.mxu1 %v2576_v0  ;;  %v601_v59 = vld [vmem:[#allocation5 + $0x170] sm:$0xff]  ;;  %v602_v60 = vld [vmem:[#allocation5 + $0x178] sm:$0xff]  ;;  %v1406_v2 = vld [vmem:[%s2930_s2] ss:$0 sm:$0xff] }
  0x64   :  { %v1407_v3 = vld [vmem:[%s2932_s4] ss:$0 sm:$0xff]  ;;  %v485_v17 = vld [vmem:[#allocation8 + $0x8] sm:$0xff]  ;;  %v486_v18 = vld [vmem:[#allocation8 + $0x10] sm:$0xff] }
  0x65   :  { %2128 = vmatpush3.bf16.msra.mxu0 %v2127_v42  ;;  %v591_v42 = vld [vmem:[#allocation5 + $0x120] sm:$0xff]  ;;  %v487_v20 = vld [vmem:[#allocation8 + $0x18] sm:$0xff]  ;;  %v489_v23 = vld [vmem:[#allocation8 + $0x28] sm:$0xff] }
  0x66   :  { %2152 = vmatpush3.bf16.msra.mxu1 %v2151_v43  ;;  %2129 = vmatprep.subr.bf16.mxu0 %v2576_v0  ;;  %v2178_v43 = vpack.c.bf16 %v305_v41, %v304_v40  ;;  %v2235_v45 = vpack.c.bf16 %v592_v44, %v591_v42  ;;  %v484_v16 = vld [vmem:[#allocation8] sm:$0xff]  ;;  %v491_v26 = vld [vmem:[#allocation8 + $0x38] sm:$0xff]  ;;  %v497_v40 = vld [vmem:[#allocation8 + $0x68] sm:$0xff] }
  0x67   :  { %2153 = vmatprep.subr.bf16.mxu1 %v2576_v0  ;;  %v488_v22 = vld [vmem:[#allocation8 + $0x20] sm:$0xff]  ;;  %v495_v34 = vld [vmem:[#allocation8 + $0x58] sm:$0xff]  ;;  %v789_v41 = vld [vmem:[#allocation7 + $0x90] sm:$0xff] }
  0x68   :  { %v2211_v24 = vpack.c.bf16 %v489_v23, %v488_v22  ;;  %v492_v30 = vld [vmem:[#allocation8 + $0x40] sm:$0xff]  ;;  %v995_v23 = vld [vmem:[#allocation5 + $0x248] sm:$0xff] }
  0x69   :  { %2131 = vmatpush3.bf16.msra.mxu0 %v2130_v48  ;;  %v2238_v48 = vpack.c.bf16 %v594_v47, %v593_v46  ;;  %v787_v35 = vld [vmem:[#allocation7 + $0x80] sm:$0xff]  ;;  %v499_v46 = vld [vmem:[#allocation8 + $0x78] sm:$0xff] }
  0x6a   :  { %2155 = vmatpush3.bf16.msra.mxu1 %v2154_v49  ;;  %2156 = vmatprep.subr.bf16.mxu0 %v2576_v0  ;;  %v595_v49 = vld [vmem:[#allocation5 + $0x140] sm:$0xff] }
  0x6b   :  { %2180 = vmatprep.subr.bf16.mxu1 %v2576_v0  ;;  %v2241_v51 = vpack.c.bf16 %v596_v50, %v595_v49  ;;  %v791_v47 = vld [vmem:[#allocation7 + $0xa0] sm:$0xff]  ;;  %v792_v49 = vld [vmem:[#allocation7 + $0xa8] sm:$0xff] }
  0x6c   :  { %1686 = vmatmul.mubr.f32.vlgmr.msra.gmra.mrb[0].mxu0 %v2725_v54  ;;  %v2283_v50 = vpack.c.bf16 %v792_v49, %v791_v47  ;;  %v994_v22 = vld [vmem:[#allocation5 + $0x240] sm:$0xff] }
  0x6d   :  { %1721 = vmatmul.mubr.f32.vlgmr.msra.gmra.mrb[0].mxu1 %v2725_v54  ;;  %2158 = vmatpush3.bf16.msra.mxu0 %v2157_v55  ;;  %v2244_v55 = vpack.c.bf16 %v598_v53, %v597_v52  ;;  %v794_v52 = vld [vmem:[#allocation7 + $0xb8] sm:$0xff]  ;;  %v687_v47 = vld [vmem:[#allocation5 + $0x180] sm:$0xff] }
  0x6e   :  { %2182 = vmatpush3.bf16.msra.mxu1 %v2181_v56  ;;  %2159 = vmatprep.subr.bf16.mxu0 %v2576_v0  ;;  %v599_v56 = vld [vmem:[#allocation5 + $0x160] sm:$0xff] }
  0x6f   :  { %2183 = vmatprep.subr.bf16.mxu1 %v2576_v0  ;;  %1790 = vmatprep.mubr.msk.f32.mxu1 %vm2577_vm0, %v2578_v1  ;;  %v2247_v58 = vpack.c.bf16 %v600_v57, %v599_v56  ;;  %v795_v57 = vld [vmem:[#allocation7 + $0xc0] sm:$0xff] }
  0x70   :  { %1755 = vmatprep.mubr.msk.f32.mxu0 %vm2577_vm0, %v2578_v1 }
  0x71   :  { %2161 = vmatpush3.bf16.msra.mxu0 %v2160_v61  ;;  %v2250_v61 = vpack.c.bf16 %v602_v60, %v601_v59  ;;  %v797_v60 = vld [vmem:[#allocation7 + $0xd0] sm:$0xff] }
  0x72   :  { %2185 = vmatpush3.bf16.msra.mxu1 %v2184_v62  ;;  %2162 = vmatprep.subr.bf16.mxu0 %v2576_v0  ;;  %v178_v62 = vlaneseq }
  0x73   :  { %2186 = vmatprep.subr.bf16.mxu1 %v2576_v0 }
  0x74   :  { %v179_v63 = vand.u32 127, %v178_v62 }
  0x75   :  { %2164 = vmatpush3.bf16.msra.mxu0 %v2163_v5 }
  0x76   :  { %2188 = vmatpush3.bf16.msra.mxu1 %v2187_v6  ;;  %2165 = vmatprep.subr.bf16.mxu0 %v2576_v0  ;;  %vm180_vm1 = vcmp.lt.s32.totalorder %v179_v63, 3  ;;  %v799_v63 = vld [vmem:[#allocation7 + $0xe0] sm:$0xff] }
  0x77   :  { %2189 = vmatprep.subr.bf16.mxu1 %v2576_v0 }
  0x79   :  { %2167 = vmatpush3.bf16.msra.mxu0 %v2166_v19  ;;  %v2205_v19 = vpack.c.bf16 %v485_v17, %v484_v16  ;;  %v990_v17 = vld [vmem:[#allocation5 + $0x220] sm:$0xff] }
  0x7a   :  { %2191 = vmatpush3.bf16.msra.mxu1 %v2190_v9  ;;  %2168 = vmatprep.subr.bf16.mxu0 %v2576_v0 }
  0x7b   :  { %2192 = vmatprep.subr.bf16.mxu1 %v2576_v0 }
  0x7d   :  { %2170 = vmatpush3.bf16.msra.mxu0 %v2169_v25  ;;  %v490_v25 = vld [vmem:[#allocation8 + $0x30] sm:$0xff] }
  0x7e   :  { %2194 = vmatpush3.bf16.msra.mxu1 %v2193_v12  ;;  %2171 = vmatprep.subr.bf16.mxu0 %v2576_v0 }
  0x7f   :  { %2195 = vmatprep.subr.bf16.mxu1 %v2576_v0 }
  0x81   :  { %2173 = vmatpush3.bf16.msra.mxu0 %v2172_v31  ;;  %v493_v31 = vld [vmem:[#allocation8 + $0x48] sm:$0xff] }
  0x82   :  { %2197 = vmatpush3.bf16.msra.mxu1 %v2196_v15  ;;  %2174 = vmatprep.subr.bf16.mxu0 %v2576_v0  ;;  %v2217_v32 = vpack.c.bf16 %v493_v31, %v492_v30  ;;  %v998_v30 = vld [vmem:[#allocation5 + $0x260] sm:$0xff]  ;;  %v999_v31 = vld [vmem:[#allocation5 + $0x268] sm:$0xff] }
  0x83   :  { %2198 = vmatprep.subr.bf16.mxu1 %v2576_v0 }
  0x85   :  { %2176 = vmatpush3.bf16.msra.mxu0 %v2175_v37  ;;  %v788_v37 = vld [vmem:[#allocation7 + $0x88] sm:$0xff] }
  0x86   :  { %2200 = vmatpush3.bf16.msra.mxu1 %v2199_v21  ;;  %2177 = vmatprep.subr.bf16.mxu0 %v2576_v0  ;;  %v2208_v21 = vpack.c.bf16 %v487_v20, %v486_v18  ;;  %v2277_v38 = vpack.c.bf16 %v788_v37, %v787_v35  ;;  %v991_v18 = vld [vmem:[#allocation5 + $0x228] sm:$0xff]  ;;  %v993_v20 = vld [vmem:[#allocation5 + $0x238] sm:$0xff]  ;;  %v2580_v37 = vmov 0  }
  0x87   :  { %2201 = vmatprep.subr.bf16.mxu1 %v2576_v0  ;;  %2433 = vset.pattern.permute.xlu1 %v2580_v37 }
  0x89   :  { %2179 = vmatpush3.bf16.msra.mxu0 %v2178_v43  ;;  %v790_v43 = vld [vmem:[#allocation7 + $0x98] sm:$0xff] }
  0x8a   :  { %2203 = vmatpush3.bf16.msra.mxu1 %v2202_v27  ;;  %2204 = vmatprep.subr.bf16.mxu0 %v2576_v0  ;;  %v2214_v27 = vpack.c.bf16 %v491_v26, %v490_v25  ;;  %v2280_v44 = vpack.c.bf16 %v790_v43, %v789_v41  ;;  %v2337_v25 = vpack.c.bf16 %v995_v23, %v994_v22  ;;  %v996_v26 = vld [vmem:[#allocation5 + $0x250] sm:$0xff]  ;;  %v2581_v22 = vmov 1   ;;  %v883_v23 = vld [vmem:[#allocation8 + $0x80] sm:$0xff] }
  0x8b   :  { %2228 = vmatprep.subr.bf16.mxu1 %v2576_v0 }
  0x8d   :  { %1791 = vmatmul.mubr.f32.vlgmr.msra.gmra.mrb[2].mxu1 %v2725_v54 }
  0x8e   :  { %2230 = vmatpush3.bf16.msra.mxu1 %v2229_v33  ;;  %1860 = vmatprep.mubr.msk.f32.mxu1 %vm2577_vm0, %v2578_v1  ;;  %v494_v33 = vld [vmem:[#allocation8 + $0x50] sm:$0xff] }
  0x8f   :  { %2231 = vmatprep.subr.bf16.mxu1 %v2576_v0  ;;  %v2220_v36 = vpack.c.bf16 %v495_v34, %v494_v33  ;;  %v1000_v33 = vld [vmem:[#allocation5 + $0x270] sm:$0xff]  ;;  %v1001_v34 = vld [vmem:[#allocation5 + $0x278] sm:$0xff] }
  0x90   :  { %v2346_v35 = vpack.c.bf16 %v1001_v34, %v1000_v33  ;;  %v890_v34 = vld [vmem:[#allocation8 + $0xb8] sm:$0xff] }
  0x92   :  { %2233 = vmatpush3.bf16.msra.mxu1 %v2232_v39  ;;  %v496_v39 = vld [vmem:[#allocation8 + $0x60] sm:$0xff] }
  0x93   :  { %2234 = vmatprep.subr.bf16.mxu1 %v2576_v0  ;;  %v2223_v42 = vpack.c.bf16 %v497_v40, %v496_v39 }
  0x96   :  { %2236 = vmatpush3.bf16.msra.mxu1 %v2235_v45  ;;  %v498_v45 = vld [vmem:[#allocation8 + $0x70] sm:$0xff] }
  0x97   :  { %2237 = vmatprep.subr.bf16.mxu1 %v2576_v0 }
  0x9a   :  { %2239 = vmatpush3.bf16.msra.mxu1 %v2238_v48  ;;  %v2226_v48 = vpack.c.bf16 %v499_v46, %v498_v45 }
  0x9b   :  { %2240 = vmatprep.subr.bf16.mxu1 %v2576_v0 }
  0x9e   :  { %2242 = vmatpush3.bf16.msra.mxu1 %v2241_v51  ;;  %v793_v51 = vld [vmem:[#allocation7 + $0xb0] sm:$0xff] }
  0x9f   :  { %2243 = vmatprep.subr.bf16.mxu1 %v2576_v0 }
  0xa2   :  { %2245 = vmatpush3.bf16.msra.mxu1 %v2244_v55  ;;  %v2286_v55 = vpack.c.bf16 %v794_v52, %v793_v51 }
  0xa3   :  { %2246 = vmatprep.subr.bf16.mxu1 %v2576_v0 }
  0xa6   :  { %2248 = vmatpush3.bf16.msra.mxu1 %v2247_v58  ;;  %v796_v58 = vld [vmem:[#allocation7 + $0xc8] sm:$0xff] }
  0xa7   :  { %2249 = vmatprep.subr.bf16.mxu1 %v2576_v0  ;;  %v2289_v59 = vpack.c.bf16 %v796_v58, %v795_v57  ;;  %v1415_v58 = vld [vmem:[%s2932_s4 + $0x4] ss:$0 sm:$0xff] }
  0xaa   :  { %2251 = vmatpush3.bf16.msra.mxu1 %v2250_v61  ;;  %v798_v61 = vld [vmem:[#allocation7 + $0xd8] sm:$0xff] }
  0xab   :  { %2276 = vmatprep.subr.bf16.mxu1 %v2576_v0  ;;  %v2292_v62 = vpack.c.bf16 %v798_v61, %v797_v60  ;;  %v692_v60 = vld [vmem:[#allocation5 + $0x1a8] sm:$0xff] }
  0xad   :  { %1861 = vmatmul.mubr.f32.vlgmr.msra.gmra.mrb[4].mxu1 %v2725_v54 }
  0xae   :  { %1930 = vmatprep.mubr.msk.f32.mxu1 %vm2577_vm0, %v2578_v1  ;;  %2278 = vmatpush3.bf16.msra.mxu1 %v2277_v38  ;;  %v1409_v38 = vld [vmem:[%s2932_s4 + $0x1] ss:$0 sm:$0xff] }
  0xaf   :  { %2279 = vmatprep.subr.bf16.mxu1 %v2576_v0 }
  0xb2   :  { %2281 = vmatpush3.bf16.msra.mxu1 %v2280_v44  ;;  %v1411_v44 = vld [vmem:[%s2932_s4 + $0x2] ss:$0 sm:$0xff] }
  0xb3   :  { %2282 = vmatprep.subr.bf16.mxu1 %v2576_v0 }
  0xb6   :  { %2284 = vmatpush3.bf16.msra.mxu1 %v2283_v50 }
  0xb7   :  { %2285 = vmatprep.subr.bf16.mxu1 %v2576_v0 }
  0xba   :  { %2287 = vmatpush3.bf16.msra.mxu1 %v2286_v55  ;;  %v689_v55 = vld [vmem:[#allocation5 + $0x190] sm:$0xff] }
  0xbb   :  { %2288 = vmatprep.subr.bf16.mxu1 %v2576_v0 }
  0xbe   :  { %2290 = vmatpush3.bf16.msra.mxu1 %v2289_v59  ;;  %v691_v59 = vld [vmem:[#allocation5 + $0x1a0] sm:$0xff] }
  0xbf   :  { %2291 = vmatprep.subr.bf16.mxu1 %v2576_v0  ;;  %v2259_v61 = vpack.c.bf16 %v692_v60, %v691_v59  ;;  %v1190_v60 = vld [vmem:[#allocation7 + $0x120] sm:$0xff] }
  0xc2   :  { %2293 = vmatpush3.bf16.msra.mxu1 %v2292_v62  ;;  %v693_v62 = vld [vmem:[#allocation5 + $0x1b0] sm:$0xff] }
  0xc3   :  { %2294 = vmatprep.subr.bf16.mxu1 %v2576_v0 }
 0x13f   :  { %v174_v4 = vpop.f32.mrb[0].mxu0 }
 0x140   :  { %v175_v5 = vadd.f32 %v1406_v2, %v174_v4  ;;  %v280_v6 = vpop.f32.mrb[0].mxu1  ;;  %v1687_v7 = vpop.f32.mrb[1].mxu0  ;;  %v800_v2 = vld [vmem:[#allocation7 + $0xe8] sm:$0xff]  ;;  %v801_v4 = vld [vmem:[#allocation7 + $0xf0] sm:$0xff] }
 0x141   :  { %v281_v8 = vadd.f32 %v1407_v3, %v280_v6  ;;  %v1722_v9 = vpop.f32.mrb[1].mxu1  ;;  %v2295_v3 = vpack.c.bf16 %v800_v2, %v799_v63  ;;  %v986_v7 = vld [vmem:[#allocation5 + $0x200] sm:$0xff]  ;;  %v694_v63 = vld [vmem:[#allocation5 + $0x1b8] sm:$0xff] }
 0x142   :  { %v2771_v10 = vsel %vm180_vm1, %v175_v5, -1e+30  ;;  %v802_v5 = vld [vmem:[#allocation7 + $0xf8] sm:$0xff]  ;;  %v987_v9 = vld [vmem:[#allocation5 + $0x208] sm:$0xff] }
 0x143   :  { %v285_v11 = vmul.f32 0.70710677, %v281_v8  ;;  %182 = vmax.xlane.f32.xlu0 %v2771_v10  ;;  %v284_v13 = vmul.f32 0.5, %v281_v8  ;;  %2296 = vmatpush3.bf16.msra.mxu1 %v2295_v3  ;;  %v2298_v6 = vpack.c.bf16 %v802_v5, %v801_v4  ;;  %v2262_v3 = vpack.c.bf16 %v694_v63, %v693_v62  ;;  %v695_v4 = vld [vmem:[#allocation5 + $0x1c0] sm:$0xff]  ;;  %v696_v5 = vld [vmem:[#allocation5 + $0x1c8] sm:$0xff]  ;;  %v1192_v62 = vld [vmem:[#allocation7 + $0x130] sm:$0xff] }
 0x144   :  { %2297 = vmatprep.subr.bf16.mxu1 %v2576_v0  ;;  %v1193_v63 = vld [vmem:[#allocation7 + $0x138] sm:$0xff] }
 0x145   :  { %2436 = verf.f32 %v285_v11 }
 0x147   :  { %2299 = vmatpush3.bf16.msra.mxu1 %v2298_v6  ;;  %v2265_v6 = vpack.c.bf16 %v696_v5, %v695_v4  ;;  %v1195_v4 = vld [vmem:[#allocation7 + $0x148] sm:$0xff] }
 0x148   :  { %2324 = vmatprep.subr.bf16.mxu1 %v2576_v0 }
 0x14a   :  { %1931 = vmatmul.mubr.f32.vlgmr.msra.gmra.mrb[6].mxu1 %v2725_v54 }
 0x14b   :  { %2000 = vmatprep.mubr.msk.f32.mxu1 %vm2577_vm0, %v2578_v1 }
 0x14f   :  { %v2437_v12 = vpop.eup %2436 }
 0x150   :  { %v287_v14 = vadd.f32 1.0, %v2437_v12  ;;  %v2325_v12 = vpack.c.bf16 %v987_v9, %v986_v7  ;;  %v697_v7 = vld [vmem:[#allocation5 + $0x1d0] sm:$0xff]  ;;  %v699_v9 = vld [vmem:[#allocation5 + $0x1e0] sm:$0xff] }
 0x152   :  { %v288_v15 = vmul.f32 %v287_v14, %v284_v13  ;;  %2326 = vmatpush3.bf16.msra.mxu1 %v2325_v12  ;;  %v988_v14 = vld [vmem:[#allocation5 + $0x210] sm:$0xff] }
 0x153   :  { %2327 = vmatprep.subr.bf16.mxu1 %v2576_v0 }
 0x154   :  { %1756 = vmatmul.mubr.f32.vlgmr.msra.gmra.mrb[2].mxu0 %v288_v15  ;;  %v989_v15 = vld [vmem:[#allocation5 + $0x218] sm:$0xff] }
 0x155   :  { %1825 = vmatprep.mubr.msk.f32.mxu0 %vm2577_vm0, %v2578_v1  ;;  %2206 = vmatpush3.bf16.msra.mxu0 %v2205_v19  ;;  %v2328_v16 = vpack.c.bf16 %v989_v15, %v988_v14  ;;  %v992_v19 = vld [vmem:[#allocation5 + $0x230] sm:$0xff]  ;;  %v702_v14 = vld [vmem:[#allocation5 + $0x1f8] sm:$0xff] }
 0x156   :  { %2207 = vmatprep.subr.bf16.mxu0 %v2576_v0 }
 0x157   :  { %2329 = vmatpush3.bf16.msra.mxu1 %v2328_v16 }
 0x158   :  { %2330 = vmatprep.subr.bf16.mxu1 %v2576_v0 }
 0x159   :  { %2209 = vmatpush3.bf16.msra.mxu0 %v2208_v21  ;;  %v2334_v21 = vpack.c.bf16 %v993_v20, %v992_v19 }
 0x15a   :  { %2210 = vmatprep.subr.bf16.mxu0 %v2576_v0 }
 0x15d   :  { %2212 = vmatpush3.bf16.msra.mxu0 %v2211_v24 }
 0x15e   :  { %2213 = vmatprep.subr.bf16.mxu0 %v2576_v0 }
 0x160   :  { %v2779_v28 = vpop.f32.mrb[2].mxu1 }
 0x161   :  { %v1792_v29 = vpop.f32.mrb[3].mxu1  ;;  %2215 = vmatpush3.bf16.msra.mxu0 %v2214_v27  ;;  %v997_v27 = vld [vmem:[#allocation5 + $0x258] sm:$0xff]  ;;  %v480_v50 = vadd.f32 %v1411_v44, %v2779_v28  ;;  %v895_v44 = vld [vmem:[#allocation8 + $0xe0] sm:$0xff] }
 0x162   :  { %2216 = vmatprep.subr.bf16.mxu0 %v2576_v0  ;;  %v2340_v29 = vpack.c.bf16 %v997_v27, %v996_v26  ;;  %v885_v26 = vld [vmem:[#allocation8 + $0x90] sm:$0xff] }
 0x165   :  { %2218 = vmatpush3.bf16.msra.mxu0 %v2217_v32  ;;  %v2343_v32 = vpack.c.bf16 %v999_v31, %v998_v30  ;;  %v887_v31 = vld [vmem:[#allocation8 + $0xa0] sm:$0xff] }
 0x166   :  { %2219 = vmatprep.subr.bf16.mxu0 %v2576_v0 }
 0x169   :  { %2221 = vmatpush3.bf16.msra.mxu0 %v2220_v36  ;;  %v2579_v36 = vmov 2  }
 0x16a   :  { %2222 = vmatprep.subr.bf16.mxu0 %v2576_v0  ;;  %2435 = vset.pattern.permute.xlu0 %v2579_v36 }
 0x16d   :  { %2224 = vmatpush3.bf16.msra.mxu0 %v2223_v42 }
 0x16e   :  { %2225 = vmatprep.subr.bf16.mxu0 %v2576_v0 }
 0x171   :  { %2227 = vmatpush3.bf16.msra.mxu0 %v2226_v48  ;;  %v688_v48 = vld [vmem:[#allocation5 + $0x188] sm:$0xff] }
 0x172   :  { %2252 = vmatprep.subr.bf16.mxu0 %v2576_v0  ;;  %v2253_v51 = vpack.c.bf16 %v688_v48, %v687_v47  ;;  %v897_v47 = vld [vmem:[#allocation8 + $0xf0] sm:$0xff]  ;;  %v898_v48 = vld [vmem:[#allocation8 + $0xf8] sm:$0xff] }
 0x180   :  { %v2789_v53 = vpop.f32.mrb[4].mxu1 }
 0x181   :  { %v1862_v56 = vpop.f32.mrb[5].mxu1  ;;  %v678_v28 = vadd.f32 %v1415_v58, %v2789_v53  ;;  %v698_v53 = vld [vmem:[#allocation5 + $0x1d8] sm:$0xff] }
 0x182   :  { %v690_v56 = vld [vmem:[#allocation5 + $0x198] sm:$0xff] }
 0x183   :  { %v2256_v57 = vpack.c.bf16 %v690_v56, %v689_v55  ;;  %v682_v2 = vmul.f32 0.70710677, %v678_v28  ;;  %v1187_v55 = vld [vmem:[#allocation7 + $0x108] sm:$0xff]  ;;  %v1189_v58 = vld [vmem:[#allocation7 + $0x118] sm:$0xff] }
 0x1d0   :  { %v183_v8 = vpop.xlane.xlu0 %182 }
 0x1d1   :  { %v184_v11 = vsub.f32 %v2771_v10, %v183_v8  ;;  %v2331_v10 = vpack.c.bf16 %v991_v18, %v990_v17  ;;  %v2268_v8 = vpack.c.bf16 %v698_v53, %v697_v7  ;;  %v681_v17 = vmul.f32 0.5, %v678_v28  ;;  %v1191_v28 = vld [vmem:[#allocation7 + $0x128] sm:$0xff]  ;;  %v1197_v7 = vld [vmem:[#allocation7 + $0x158] sm:$0xff] }
 0x1d3   :  { %v185_v13 = vmul.f32 1.442695, %v184_v11  ;;  %2332 = vmatpush3.bf16.msra.mxu1 %v2331_v10  ;;  %v700_v11 = vld [vmem:[#allocation5 + $0x1e8] sm:$0xff] }
 0x1d4   :  { %2333 = vmatprep.subr.bf16.mxu1 %v2576_v0  ;;  %v2271_v12 = vpack.c.bf16 %v700_v11, %v699_v9  ;;  %v1199_v9 = vld [vmem:[#allocation7 + $0x168] sm:$0xff] }
 0x1d5   :  { %2438 = vpow2.f32 %v185_v13  ;;  %v701_v13 = vld [vmem:[#allocation5 + $0x1f0] sm:$0xff] }
 0x1d6   :  { %v2274_v16 = vpack.c.bf16 %v702_v14, %v701_v13  ;;  %v1201_v13 = vld [vmem:[#allocation7 + $0x178] sm:$0xff] }
 0x1d7   :  { %2335 = vmatpush3.bf16.msra.mxu1 %v2334_v21 }
 0x1d8   :  { %2336 = vmatprep.subr.bf16.mxu1 %v2576_v0 }
 0x1db   :  { %2338 = vmatpush3.bf16.msra.mxu1 %v2337_v25  ;;  %v884_v25 = vld [vmem:[#allocation8 + $0x88] sm:$0xff] }
 0x1dc   :  { %2339 = vmatprep.subr.bf16.mxu1 %v2576_v0  ;;  %v2301_v27 = vpack.c.bf16 %v884_v25, %v883_v23  ;;  %v1419_v23 = vld [vmem:[%s2932_s4 + $0x6] ss:$0 sm:$0xff] }
 0x1df   :  { %v2803_v24 = vpop.eup %2438  ;;  %2341 = vmatpush3.bf16.msra.mxu1 %v2340_v29  ;;  %v886_v29 = vld [vmem:[#allocation8 + $0x98] sm:$0xff] }
 0x1e0   :  { %187 = vadd.xlane.f32.xlu0 %v2803_v24  ;;  %2342 = vmatprep.subr.bf16.mxu1 %v2576_v0  ;;  %v2304_v30 = vpack.c.bf16 %v886_v29, %v885_v26  ;;  %v1087_v29 = vld [vmem:[#allocation5 + $0x288] sm:$0xff] }
 0x1e3   :  { %2344 = vmatpush3.bf16.msra.mxu1 %v2343_v32  ;;  %v888_v32 = vld [vmem:[#allocation8 + $0xa8] sm:$0xff] }
 0x1e4   :  { %2345 = vmatprep.subr.bf16.mxu1 %v2576_v0  ;;  %v2307_v33 = vpack.c.bf16 %v888_v32, %v887_v31 }
 0x1e7   :  { %2347 = vmatpush3.bf16.msra.mxu1 %v2346_v35 }
 0x1e8   :  { %2372 = vmatprep.subr.bf16.mxu1 %v2576_v0 }
 0x1ea   :  { %2001 = vmatmul.mubr.f32.vlgmr.msra.gmra.mrb[8].mxu1 %v2725_v54 }
 0x1eb   :  { %2070 = vmatprep.mubr.msk.f32.mxu1 %vm2577_vm0, %v2578_v1 }
 0x21d   :  { %v2841_v36 = vpop.f32.mrb[6].mxu1 }
 0x21e   :  { %v1932_v37 = vpop.f32.mrb[7].mxu1  ;;  %v878_v31 = vadd.f32 %v1419_v23, %v2841_v36 }
 0x21f   :  { %v1424_v37 = vld [vmem:[%s2932_s4 + $0x8] ss:$0 sm:$0xff] }
 0x227   :  { %v380_v39 = vpop.f32.mrb[2].mxu0 }
 0x228   :  { %v381_v40 = vadd.f32 %v1409_v38, %v380_v39  ;;  %v1757_v41 = vpop.f32.mrb[3].mxu0  ;;  %v891_v38 = vld [vmem:[#allocation8 + $0xc0] sm:$0xff]  ;;  %v892_v39 = vld [vmem:[#allocation8 + $0xc8] sm:$0xff] }
 0x229   :  { %v893_v41 = vld [vmem:[#allocation8 + $0xd0] sm:$0xff] }
 0x22a   :  { %v385_v42 = vmul.f32 0.70710677, %v381_v40  ;;  %v384_v45 = vmul.f32 0.5, %v381_v40  ;;  %v2313_v40 = vpack.c.bf16 %v892_v39, %v891_v38  ;;  %v1090_v38 = vld [vmem:[#allocation5 + $0x2a0] sm:$0xff]  ;;  %v1091_v39 = vld [vmem:[#allocation5 + $0x2a8] sm:$0xff] }
 0x22c   :  { %2440 = verf.f32 %v385_v42  ;;  %v894_v42 = vld [vmem:[#allocation8 + $0xd8] sm:$0xff] }
 0x22d   :  { %2442 = verf.f32 %v682_v2  ;;  %v2382_v2 = vpack.c.bf16 %v1193_v63, %v1192_v62  ;;  %v1282_v62 = vld [vmem:[#allocation8 + $0x100] sm:$0xff]  ;;  %v1283_v63 = vld [vmem:[#allocation8 + $0x108] sm:$0xff] }
 0x236   :  { %v2441_v43 = vpop.eup %2440 }
 0x237   :  { %v387_v46 = vadd.f32 1.0, %v2441_v43  ;;  %v2443_v15 = vpop.eup %2442  ;;  %v2316_v43 = vpack.c.bf16 %v894_v42, %v893_v41  ;;  %v1092_v41 = vld [vmem:[#allocation5 + $0x2b0] sm:$0xff]  ;;  %v1093_v42 = vld [vmem:[#allocation5 + $0x2b8] sm:$0xff] }
 0x238   :  { %v684_v18 = vadd.f32 1.0, %v2443_v15  ;;  %v1413_v15 = vld [vmem:[%s2932_s4 + $0x3] ss:$0 sm:$0xff] }
 0x239   :  { %v388_v49 = vmul.f32 %v387_v46, %v384_v45  ;;  %v896_v45 = vld [vmem:[#allocation8 + $0xe8] sm:$0xff] }
 0x23a   :  { %v685_v10 = vmul.f32 %v684_v18, %v681_v17  ;;  %v2319_v46 = vpack.c.bf16 %v896_v45, %v895_v44  ;;  %v2358_v44 = vpack.c.bf16 %v1093_v42, %v1092_v41  ;;  %v1094_v45 = vld [vmem:[#allocation5 + $0x2c0] sm:$0xff] }
 0x23b   :  { %v483_v52 = vadd.f32 %v480_v50, %v388_v49  ;;  %v2322_v49 = vpack.c.bf16 %v898_v48, %v897_v47  ;;  %v1096_v48 = vld [vmem:[#allocation5 + $0x2d0] sm:$0xff] }
 0x23d   :  { %1826 = vmatmul.mubr.f32.vlgmr.msra.gmra.mrb[4].mxu0 %v483_v52  ;;  %v1186_v52 = vld [vmem:[#allocation7 + $0x100] sm:$0xff] }
 0x23e   :  { %2254 = vmatpush3.bf16.msra.mxu0 %v2253_v51  ;;  %1895 = vmatprep.mubr.msk.f32.mxu0 %vm2577_vm0, %v2578_v1  ;;  %v2373_v56 = vpack.c.bf16 %v1187_v55, %v1186_v52  ;;  %v1099_v52 = vld [vmem:[#allocation5 + $0x2e8] sm:$0xff] }
 0x23f   :  { %2255 = vmatprep.subr.bf16.mxu0 %v2576_v0 }
 0x240   :  { %2374 = vmatpush3.bf16.msra.mxu1 %v2373_v56  ;;  %v1100_v56 = vld [vmem:[#allocation5 + $0x2f0] sm:$0xff] }
 0x241   :  { %2375 = vmatprep.subr.bf16.mxu1 %v2576_v0 }
 0x242   :  { %2257 = vmatpush3.bf16.msra.mxu0 %v2256_v57  ;;  %v1188_v57 = vld [vmem:[#allocation7 + $0x110] sm:$0xff] }
 0x243   :  { %2258 = vmatprep.subr.bf16.mxu0 %v2576_v0  ;;  %v2376_v59 = vpack.c.bf16 %v1189_v58, %v1188_v57  ;;  %v1101_v57 = vld [vmem:[#allocation5 + $0x2f8] sm:$0xff] }
 0x245   :  { %2377 = vmatpush3.bf16.msra.mxu1 %v2376_v59  ;;  %v2370_v59 = vpack.c.bf16 %v1101_v57, %v1100_v56 }
 0x246   :  { %2260 = vmatpush3.bf16.msra.mxu0 %v2259_v61  ;;  %2378 = vmatprep.subr.bf16.mxu1 %v2576_v0  ;;  %v2379_v61 = vpack.c.bf16 %v1191_v28, %v1190_v60 }
 0x247   :  { %2261 = vmatprep.subr.bf16.mxu0 %v2576_v0 }
 0x249   :  { %2380 = vmatpush3.bf16.msra.mxu1 %v2379_v61 }
 0x24a   :  { %2263 = vmatpush3.bf16.msra.mxu0 %v2262_v3  ;;  %2381 = vmatprep.subr.bf16.mxu1 %v2576_v0  ;;  %v1194_v3 = vld [vmem:[#allocation7 + $0x140] sm:$0xff] }
 0x24b   :  { %2264 = vmatprep.subr.bf16.mxu0 %v2576_v0  ;;  %v2385_v5 = vpack.c.bf16 %v1195_v4, %v1194_v3  ;;  %v2397_v3 = vpack.c.bf16 %v1283_v63, %v1282_v62  ;;  %v1285_v4 = vld [vmem:[#allocation8 + $0x118] sm:$0xff] }
 0x24d   :  { %2383 = vmatpush3.bf16.msra.mxu1 %v2382_v2  ;;  %v1284_v2 = vld [vmem:[#allocation8 + $0x110] sm:$0xff] }
 0x24e   :  { %2266 = vmatpush3.bf16.msra.mxu0 %v2265_v6  ;;  %2384 = vmatprep.subr.bf16.mxu1 %v2576_v0  ;;  %v1196_v6 = vld [vmem:[#allocation7 + $0x150] sm:$0xff] }
 0x24f   :  { %2267 = vmatprep.subr.bf16.mxu0 %v2576_v0  ;;  %v2388_v53 = vpack.c.bf16 %v1197_v7, %v1196_v6  ;;  %v1286_v6 = vld [vmem:[#allocation8 + $0x120] sm:$0xff]  ;;  %v1287_v7 = vld [vmem:[#allocation8 + $0x128] sm:$0xff] }
 0x251   :  { %2386 = vmatpush3.bf16.msra.mxu1 %v2385_v5  ;;  %v2400_v5 = vpack.c.bf16 %v1285_v4, %v1284_v2 }
 0x252   :  { %2269 = vmatpush3.bf16.msra.mxu0 %v2268_v8  ;;  %2387 = vmatprep.subr.bf16.mxu1 %v2576_v0  ;;  %v1198_v8 = vld [vmem:[#allocation7 + $0x160] sm:$0xff] }
 0x253   :  { %2270 = vmatprep.subr.bf16.mxu0 %v2576_v0  ;;  %v2391_v11 = vpack.c.bf16 %v1199_v9, %v1198_v8  ;;  %v1288_v8 = vld [vmem:[#allocation8 + $0x130] sm:$0xff] }
 0x255   :  { %2389 = vmatpush3.bf16.msra.mxu1 %v2388_v53  ;;  %v2403_v53 = vpack.c.bf16 %v1287_v7, %v1286_v6 }
 0x256   :  { %2272 = vmatpush3.bf16.msra.mxu0 %v2271_v12  ;;  %2390 = vmatprep.subr.bf16.mxu1 %v2576_v0  ;;  %v1200_v12 = vld [vmem:[#allocation7 + $0x170] sm:$0xff] }
 0x257   :  { %2273 = vmatprep.subr.bf16.mxu0 %v2576_v0  ;;  %v2394_v14 = vpack.c.bf16 %v1201_v13, %v1200_v12  ;;  %v1291_v12 = vld [vmem:[#allocation8 + $0x148] sm:$0xff] }
 0x259   :  { %2392 = vmatpush3.bf16.msra.mxu1 %v2391_v11  ;;  %v1290_v11 = vld [vmem:[#allocation8 + $0x140] sm:$0xff] }
 0x25a   :  { %2275 = vmatpush3.bf16.msra.mxu0 %v2274_v16  ;;  %2393 = vmatprep.subr.bf16.mxu1 %v2576_v0  ;;  %v2409_v13 = vpack.c.bf16 %v1291_v12, %v1290_v11 }
 0x25b   :  { %2300 = vmatprep.subr.bf16.mxu0 %v2576_v0 }
 0x25d   :  { %1896 = vmatmul.mubr.f32.vlgmr.msra.gmra.mrb[6].mxu0 %v685_v10  ;;  %2395 = vmatpush3.bf16.msra.mxu1 %v2394_v14  ;;  %v1417_v10 = vld [vmem:[%s2932_s4 + $0x5] ss:$0 sm:$0xff]  ;;  %v1292_v14 = vld [vmem:[#allocation8 + $0x150] sm:$0xff] }
 0x25e   :  { %1965 = vmatprep.mubr.msk.f32.mxu0 %vm2577_vm0, %v2578_v1  ;;  %2302 = vmatpush3.bf16.msra.mxu0 %v2301_v27  ;;  %v1086_v27 = vld [vmem:[#allocation5 + $0x280] sm:$0xff] }
 0x25f   :  { %2303 = vmatprep.subr.bf16.mxu0 %v2576_v0  ;;  %v2349_v32 = vpack.c.bf16 %v1087_v29, %v1086_v27 }
 0x260   :  { %2071 = vmatmul.mubr.f32.vlgmr.msra.gmra.mrb[10].mxu1 %v2725_v54 }
 0x262   :  { %2305 = vmatpush3.bf16.msra.mxu0 %v2304_v30 }
 0x263   :  { %2306 = vmatprep.subr.bf16.mxu0 %v2576_v0 }
 0x266   :  { %2308 = vmatpush3.bf16.msra.mxu0 %v2307_v33 }
 0x267   :  { %2309 = vmatprep.subr.bf16.mxu0 %v2576_v0 }
 0x26d   :  { %v188_v19 = vpop.xlane.xlu0 %187 }
 0x26e   :  { %2444 = vrcp.f32 %v188_v19 }
 0x278   :  { %v2445_v20 = vpop.eup %2444 }
 0x279   :  { %v190_v21 = vmul.f32 %v2445_v20, %v2803_v24  ;;  %v889_v24 = vld [vmem:[#allocation8 + $0xb0] sm:$0xff] }
 0x27a   :  { %v2310_v35 = vpack.c.bf16 %v890_v34, %v889_v24  ;;  %v1088_v24 = vld [vmem:[#allocation5 + $0x290] sm:$0xff]  ;;  %v1089_v34 = vld [vmem:[#allocation5 + $0x298] sm:$0xff] }
 0x27b   :  { %1379 = vperm.xlu0 %2435, %v190_v21   ;;  %581 = vperm.xlu1 %2433, %v190_v21  }
 0x27c   :  { %2311 = vmatpush3.bf16.msra.mxu0 %v2310_v35  ;;  %v2352_v35 = vpack.c.bf16 %v1089_v34, %v1088_v24  ;;  %v1426_v24 = vld [vmem:[%s2932_s4 + $0x9] ss:$0 sm:$0xff] }
 0x27d   :  { %2312 = vmatprep.subr.bf16.mxu0 %v2576_v0 }
 0x27f   :  { %2434 = vset.pattern.permute.xlu1 %v2581_v22 }
 0x280   :  { %980 = vperm.xlu1 %2434, %v190_v21   ;;  %2314 = vmatpush3.bf16.msra.mxu0 %v2313_v40  ;;  %v2355_v40 = vpack.c.bf16 %v1091_v39, %v1090_v38  ;;  %v1428_v39 = vld [vmem:[%s2932_s4 + $0xa] ss:$0 sm:$0xff] }
 0x281   :  { %2315 = vmatprep.subr.bf16.mxu0 %v2576_v0 }
 0x284   :  { %2317 = vmatpush3.bf16.msra.mxu0 %v2316_v43 }
 0x285   :  { %2318 = vmatprep.subr.bf16.mxu0 %v2576_v0 }
 0x288   :  { %2320 = vmatpush3.bf16.msra.mxu0 %v2319_v46  ;;  %v1095_v46 = vld [vmem:[#allocation5 + $0x2c8] sm:$0xff] }
 0x289   :  { %2321 = vmatprep.subr.bf16.mxu0 %v2576_v0  ;;  %v2361_v47 = vpack.c.bf16 %v1095_v46, %v1094_v45 }
 0x28c   :  { %2323 = vmatpush3.bf16.msra.mxu0 %v2322_v49  ;;  %v1097_v49 = vld [vmem:[#allocation5 + $0x2d8] sm:$0xff] }
 0x28d   :  { %2348 = vmatprep.subr.bf16.mxu0 %v2576_v0 }
 0x2bd   :  { %v2848_v50 = vpop.f32.mrb[8].mxu1 }
 0x2be   :  { %v2002_v51 = vpop.f32.mrb[9].mxu1  ;;  %v1077_v36 = vadd.f32 %v1424_v37, %v2848_v50  ;;  %v2364_v50 = vpack.c.bf16 %v1097_v49, %v1096_v48 }
 0x2bf   :  { %v1098_v51 = vld [vmem:[#allocation5 + $0x2e0] sm:$0xff] }
 0x2c0   :  { %v1081_v43 = vmul.f32 0.70710677, %v1077_v36  ;;  %v2367_v55 = vpack.c.bf16 %v1099_v52, %v1098_v51  ;;  %v1080_v60 = vmul.f32 0.5, %v1077_v36 }
 0x2fa   :  { %v1380_v48 = vpop.permute.xlu0 %1379 }
 0x310   :  { %v574_v16 = vpop.f32.mrb[4].mxu0 }
 0x311   :  { %v2861_v17 = vadd.f32 %v1413_v15, %v574_v16  ;;  %v1827_v18 = vpop.f32.mrb[5].mxu0  ;;  %v1293_v15 = vld [vmem:[#allocation8 + $0x158] sm:$0xff] }
 0x312   :  { %v2412_v16 = vpack.c.bf16 %v1293_v15, %v1292_v14  ;;  %v1294_v18 = vld [vmem:[#allocation8 + $0x160] sm:$0xff] }
 0x313   :  { %578 = vst [vmem:[%s2936_s8] sm:$0xff] %v2861_v17 }
 0x330   :  { %v777_v19 = vpop.f32.mrb[6].mxu0 }
 0x331   :  { %v778_v20 = vadd.f32 %v1417_v10, %v777_v19  ;;  %v1897_v54 = vpop.f32.mrb[7].mxu0  ;;  %v1295_v10 = vld [vmem:[#allocation8 + $0x168] sm:$0xff] }
 0x332   :  { %v2415_v19 = vpack.c.bf16 %v1295_v10, %v1294_v18  ;;  %v1297_v54 = vld [vmem:[#allocation8 + $0x178] sm:$0xff] }
 0x333   :  { %v782_v21 = vmul.f32 0.70710677, %v778_v20  ;;  %v781_v25 = vmul.f32 0.5, %v778_v20  ;;  %v1296_v20 = vld [vmem:[#allocation8 + $0x170] sm:$0xff] }
 0x335   :  { %2446 = verf.f32 %v782_v21  ;;  %v1276_v21 = vpop.f32.mrb[10].mxu1 }
 0x336   :  { %2448 = verf.f32 %v1081_v43  ;;  %v2072_v23 = vpop.f32.mrb[11].mxu1  ;;  %v1277_v41 = vadd.f32 %v1428_v39, %v1276_v21 }
 0x33f   :  { %v2447_v22 = vpop.eup %2446 }
 0x340   :  { %v784_v26 = vadd.f32 1.0, %v2447_v22  ;;  %v2449_v58 = vpop.eup %2448  ;;  %v2418_v22 = vpack.c.bf16 %v1297_v54, %v1296_v20 }
 0x341   :  { %v1083_v28 = vadd.f32 1.0, %v2449_v58 }
 0x342   :  { %v785_v30 = vmul.f32 %v784_v26, %v781_v25  ;;  %v582_v25 = vpop.permute.xlu1 %581  ;;  %v1421_v26 = vld [vmem:[%s2932_s4 + $0x7] ss:$0 sm:$0xff] }
 0x343   :  { %v1084_v61 = vmul.f32 %v1083_v28, %v1080_v60 }
 0x344   :  { %v881_v33 = vadd.f32 %v878_v31, %v785_v30 }
 0x346   :  { %1966 = vmatmul.mubr.f32.vlgmr.msra.gmra.mrb[8].mxu0 %v881_v33  ;;  %v981_v31 = vpop.permute.xlu1 %980 }
 0x347   :  { %2350 = vmatpush3.bf16.msra.mxu0 %v2349_v32  ;;  %2035 = vmatprep.mubr.msk.f32.mxu0 %vm2577_vm0, %v2578_v1  ;;  %v584_v32 = vmul.f32 %v582_v25, %v2861_v17 }
 0x348   :  { %2351 = vmatprep.subr.bf16.mxu0 %v2576_v0 }
 0x34b   :  { %2353 = vmatpush3.bf16.msra.mxu0 %v2352_v35 }
 0x34c   :  { %2354 = vmatprep.subr.bf16.mxu0 %v2576_v0 }
 0x34f   :  { %2356 = vmatpush3.bf16.msra.mxu0 %v2355_v40 }
 0x350   :  { %2357 = vmatprep.subr.bf16.mxu0 %v2576_v0 }
 0x353   :  { %2359 = vmatpush3.bf16.msra.mxu0 %v2358_v44  ;;  %v1430_v44 = vld [vmem:[%s2932_s4 + $0xb] ss:$0 sm:$0xff] }
 0x354   :  { %2360 = vmatprep.subr.bf16.mxu0 %v2576_v0 }
 0x357   :  { %2362 = vmatpush3.bf16.msra.mxu0 %v2361_v47 }
 0x358   :  { %2363 = vmatprep.subr.bf16.mxu0 %v2576_v0 }
 0x35b   :  { %2365 = vmatpush3.bf16.msra.mxu0 %v2364_v50 }
 0x35c   :  { %2366 = vmatprep.subr.bf16.mxu0 %v2576_v0 }
 0x35f   :  { %2368 = vmatpush3.bf16.msra.mxu0 %v2367_v55 }
 0x360   :  { %2369 = vmatprep.subr.bf16.mxu0 %v2576_v0 }
 0x363   :  { %2371 = vmatpush3.bf16.msra.mxu0 %v2370_v59 }
 0x364   :  { %2396 = vmatprep.subr.bf16.mxu0 %v2576_v0 }
 0x366   :  { %2036 = vmatmul.mubr.f32.vlgmr.msra.gmra.mrb[10].mxu0 %v1084_v61 }
 0x367   :  { %2105 = vmatprep.mubr.msk.f32.mxu0 %vm2577_vm0, %v2578_v1  ;;  %2398 = vmatpush3.bf16.msra.mxu0 %v2397_v3  ;;  %v1289_v1 = vld [vmem:[#allocation8 + $0x138] sm:$0xff] }
 0x368   :  { %2399 = vmatprep.subr.bf16.mxu0 %v2576_v0  ;;  %v2406_v9 = vpack.c.bf16 %v1289_v1, %v1288_v8 }
 0x36b   :  { %2401 = vmatpush3.bf16.msra.mxu0 %v2400_v5 }
 0x36c   :  { %2402 = vmatprep.subr.bf16.mxu0 %v2576_v0 }
 0x36f   :  { %2404 = vmatpush3.bf16.msra.mxu0 %v2403_v53 }
 0x370   :  { %2405 = vmatprep.subr.bf16.mxu0 %v2576_v0 }
 0x373   :  { %2407 = vmatpush3.bf16.msra.mxu0 %v2406_v9 }
 0x374   :  { %2408 = vmatprep.subr.bf16.mxu0 %v2576_v0 }
 0x377   :  { %2410 = vmatpush3.bf16.msra.mxu0 %v2409_v13 }
 0x378   :  { %2411 = vmatprep.subr.bf16.mxu0 %v2576_v0 }
 0x37b   :  { %2413 = vmatpush3.bf16.msra.mxu0 %v2412_v16 }
 0x37c   :  { %2414 = vmatprep.subr.bf16.mxu0 %v2576_v0 }
 0x37f   :  { %2416 = vmatpush3.bf16.msra.mxu0 %v2415_v19 }
 0x380   :  { %2417 = vmatprep.subr.bf16.mxu0 %v2576_v0 }
 0x383   :  { %2419 = vmatpush3.bf16.msra.mxu0 %v2418_v22 }
 0x419   :  { %v973_v27 = vpop.f32.mrb[8].mxu0 }
 0x41a   :  { %v974_v29 = vadd.f32 %v1421_v26, %v973_v27  ;;  %v1967_v30 = vpop.f32.mrb[9].mxu0 }
 0x41c   :  { %1422 = vst [vmem:[%s2936_s8 + $0x8] sm:$0xff] %v974_v29  ;;  %v983_v0 = vmul.f32 %v981_v31, %v974_v29 }
 0x41e   :  { %v984_v33 = vadd.f32 %v983_v0, %v584_v32 }
 0x439   :  { %v1176_v34 = vpop.f32.mrb[10].mxu0 }
 0x43a   :  { %v1177_v35 = vadd.f32 %v1426_v24, %v1176_v34  ;;  %v2037_v37 = vpop.f32.mrb[11].mxu0 }
 0x43c   :  { %v1181_v38 = vmul.f32 0.70710677, %v1177_v35  ;;  %v1180_v36 = vmul.f32 0.5, %v1177_v35 }
 0x43e   :  { %2450 = verf.f32 %v1181_v38 }
 0x448   :  { %v2451_v17 = vpop.eup %2450 }
 0x449   :  { %v1183_v40 = vadd.f32 1.0, %v2451_v17 }
 0x44b   :  { %v1184_v42 = vmul.f32 %v1183_v40, %v1180_v36 }
 0x44d   :  { %v1280_v43 = vadd.f32 %v1277_v41, %v1184_v42 }
 0x44f   :  { %2106 = vmatmul.mubr.f32.vlgmr.msra.gmra.mrb[12].mxu0 %v1280_v43 }
 0x522   :  { %v1372_v45 = vpop.f32.mrb[12].mxu0 }
 0x523   :  { %v1373_v46 = vadd.f32 %v1430_v44, %v1372_v45  ;;  %v2107_v47 = vpop.f32.mrb[13].mxu0 }
 0x525   :  { %1431 = vst [vmem:[%s2936_s8 + $0x10] sm:$0xff] %v1373_v46  ;;  %v1382_v49 = vmul.f32 %v1380_v48, %v1373_v46 }
 0x527   :  { %v1383_v50 = vadd.f32 %v1382_v49, %v984_v33 }
 0x529   :  { %1384 = vst [vmem:[#allocation10] sm:$0xff] %v1383_v50 }
 0x52a   :  { %2551 = shalt.err (!%p2548_p8)
}
 0x52b   :  { %s2552_s15 = scalar_lea.hbm %s2935_s7, 128 }
 0x52c   :  { %p2553_p9 = scmp.ne.s32.totalorder %s2935_s7, %s2552_s15  ;;  %p2556_p10 = scmp.lt.u32.totalorder %s2552_s15, %s2935_s7 }
 0x52e   :  { %p2558_p11 = pnand %p2556_p10, %p2553_p9 }
 0x530   :  { %2561 = shalt.err (!%p2558_p11)
}
 0x531   :  { %1394 = dma.vmem_to_hbm [thread:$0]  %s1392_s11, 128, %s2935_s7, [#allocation4]  }
 0x532   :  { %2568 = dma.done.wait [#allocation4], 128  }
 0x533   :  { %2569 = vsyncadd [#allocation4], 4294967168 }
 0x534   :  { %1402 = vsyncpa [#allocation3], 1 }
 0x535   :  { %1403 = vsyncpa [#allocation6], 1 }
 0x536   :  { %1404 = vsyncpa [#allocation9], 1 }
 0x537   :  { %1405 = vsyncpa [#allocation4], 1 }

</bundles_post_ra>
